<compile_context>
chip_gen: v7x
topology: tpu7x:2x2x1
jax: 0.10.0
libtpu: 0.0.40
codegen_flags: <defaults>
</compile_context>

<pallas_src>
import functools

import jax
import jax.numpy as jnp
from jax.experimental import pallas as pl
from jax.experimental.pallas import tpu as pltpu

IN_FEATURES = 16 * 192   # 3072
HIDDEN = 100
OUT = 10
OUT_PAD = 128            # pad 10 -> 128 lanes (lane-dense output block)

# --- device-dependent defaults (picked once at import) -----------------------
try:
    _DEVICE_KIND = jax.devices()[0].device_kind.lower()
except Exception:  # defensive: no backend available yet
    _DEVICE_KIND = ""
_IS_V7 = "v7" in _DEVICE_KIND
# v7x: ~3.2 TB/s HBM -> bigger batch tile to amortize per-grid-step overhead;
# needs an explicit vmem limit (> default 32 MiB scoped, < 64 MiB physical).
DEFAULT_TM = 1024 if _IS_V7 else 512
_VMEM_LIMIT_BYTES = (48 << 20) if _IS_V7 else None


def _round_up(n, m):
    return ((n + m - 1) // m) * m


def _affine_kernel(x_ref, w_ref, b_ref, o_ref):
    # x: (TM, 3072)   w: (3072, 128)   b: (1, 128)   o: (TM, 128)
    o_ref[...] = (
        jnp.dot(x_ref[...], w_ref[...], preferred_element_type=jnp.float32)
        + b_ref[...]
    )


def fold_and_pad_params(w1, b1, w2, b2):
    """Fold the two Linears (no activation between them) into one affine map
    and pad the narrow output dim to 128 lanes.  Call ONCE, not per forward."""
    w = jnp.matmul(w1, w2)           # (3072, 10)
    b = jnp.matmul(b1, w2) + b2      # (10,)
    w_p = jnp.zeros((IN_FEATURES, OUT_PAD), jnp.float32).at[:, :OUT].set(w)
    b_p = jnp.zeros((1, OUT_PAD), jnp.float32).at[0, :OUT].set(b)
    return w_p, b_p


@functools.partial(jax.jit, static_argnames=("tm",))
def classifier_forward(x_flat, w_p, b_p, *, tm=DEFAULT_TM):
    """x_flat: (B, 3072) f32.  Params from fold_and_pad_params().  -> (B, 10)."""
    B = x_flat.shape[0]
    rows_out = _round_up(B, 8)        # full sublanes -> unmasked output stores

    # Batch tile: multiple of 8 sublanes, no larger than the (padded) batch.
    tm = max(8, min(tm, rows_out))
    if _IS_V7 and rows_out > 8:
        # Guarantee >= 2 grid steps so ("parallel",) actually shards the batch
        # across both v7x TensorCores (single-TC chips are unaffected).
        tm = min(tm, _round_up(pl.cdiv(rows_out, 2), 8))

    grid = (pl.cdiv(rows_out, tm),)

    cost = pl.CostEstimate(
        flops=2 * B * IN_FEATURES * OUT_PAD,
        transcendentals=0,
        bytes_accessed=(B * IN_FEATURES * 4          # x read (dominant)
                        + IN_FEATURES * OUT_PAD * 4  # folded weight
                        + OUT_PAD * 4                # folded bias
                        + rows_out * OUT_PAD * 4),   # output write
    )

    out_padded = pl.pallas_call(
        _affine_kernel,
        out_shape=jax.ShapeDtypeStruct((rows_out, OUT_PAD), jnp.float32),
        grid=grid,
        in_specs=[
            # x tiles stream along the batch grid (Pallas double-buffers them;
            # the last, possibly partial, block is handled by masked edge DMA).
            pl.BlockSpec((tm, IN_FEATURES), lambda i: (i, 0)),
            # Folded weight / bias: constant index_map -> VMEM-resident.
            pl.BlockSpec((IN_FEATURES, OUT_PAD), lambda i: (0, 0)),
            pl.BlockSpec((1, OUT_PAD), lambda i: (0, 0)),
        ],
        out_specs=pl.BlockSpec((tm, OUT_PAD), lambda i: (i, 0)),
        compiler_params=pltpu.CompilerParams(
            dimension_semantics=("parallel",),        # megacore sharding on v7x
            vmem_limit_bytes=_VMEM_LIMIT_BYTES if tm > 512 else None,
        ),
        cost_estimate=cost,
    )(x_flat, w_p, b_p)

    return out_padded[:B, :OUT]


def init_params(key):
    """Deterministic init mimicking torch.nn.Linear (uniform +/- 1/sqrt(fan_in))."""
    k1, k2, k3, k4 = jax.random.split(key, 4)
    bound1 = 1.0 / (IN_FEATURES ** 0.5)
    bound2 = 1.0 / (HIDDEN ** 0.5)
    # Stored as (in, out) = PyTorch weight.T
    w1 = jax.random.uniform(k1, (IN_FEATURES, HIDDEN), jnp.float32, -bound1, bound1)
    b1 = jax.random.uniform(k2, (HIDDEN,), jnp.float32, -bound1, bound1)
    w2 = jax.random.uniform(k3, (HIDDEN, OUT), jnp.float32, -bound2, bound2)
    b2 = jax.random.uniform(k4, (OUT,), jnp.float32, -bound2, bound2)
    return w1, b1, w2, b2


if __name__ == "__main__":
    key = jax.random.PRNGKey(0)
    kx, kp = jax.random.split(key)

    B = 2
    # Input as the module implies: anything flattening to 16*192 per sample.
    x = jax.random.normal(kx, (B, 16, 192), jnp.float32)
    x_flat = x.reshape(B, -1)  # glue: the PyTorch .reshape(len(x), -1)

    w1, b1, w2, b2 = init_params(kp)
    w_p, b_p = fold_and_pad_params(w1, b1, w2, b2)  # folded/padded once, reused

    out = classifier_forward(x_flat, w_p, b_p)
    out = jax.block_until_ready(out)

    # Pure-JAX reference of the UNFUSED PyTorch forward.
    ref = (x_flat @ w1 + b1) @ w2 + b2
    assert out.shape == (B, OUT), out.shape
    assert jnp.allclose(out, ref, atol=1e-4, rtol=1e-4), float(jnp.max(jnp.abs(out - ref)))

    print("KERNEL_OK")
</pallas_src>

<mosaic_0001>
module attributes {stable_mosaic.version = 11 : i64} {
  func.func @_affine_kernel(%arg0: i32, %arg1: memref<8x3072xf32, #tpu.memory_space<vmem>>, %arg2: memref<3072x128xf32, #tpu.memory_space<vmem>>, %arg3: memref<1x128xf32, #tpu.memory_space<vmem>>, %arg4: memref<8x128xf32, #tpu.memory_space<vmem>>) attributes {dimension_semantics = [#tpu.dimension_semantics<parallel>], iteration_bounds = array<i64: 1>, scalar_prefetch = 0 : i64, scratch_operands = 0 : i64, tpu.core_type = #tpu.core_type<tc>, window_params = [{transform_indices = @transform_0, window_bounds = array<i64: 8, 3072>}, {pipeline_mode = #tpu.pipeline_mode<synchronous>, transform_indices = @transform_1, window_bounds = array<i64: 3072, 128>}, {pipeline_mode = #tpu.pipeline_mode<synchronous>, transform_indices = @transform_2, window_bounds = array<i64: 1, 128>}, {transform_indices = @transform_3, window_bounds = array<i64: 8, 128>}]} {
    %c0 = arith.constant 0 : index
    %c0_0 = arith.constant 0 : index
    %0 = vector.load %arg1[%c0, %c0_0] : memref<8x3072xf32, #tpu.memory_space<vmem>>, vector<8x3072xf32>
    %c0_1 = arith.constant 0 : index
    %c0_2 = arith.constant 0 : index
    %1 = vector.load %arg2[%c0_1, %c0_2] : memref<3072x128xf32, #tpu.memory_space<vmem>>, vector<3072x128xf32>
    %cst = arith.constant dense<0.000000e+00> : vector<8x128xf32>
    %2 = tpu.matmul %0, %1, %cst {dimension_numbers = #tpu.dot_dimension_numbers<[1], [0], [0], [1], [0, 0, 1, 1], [], []>} : vector<8x3072xf32>, vector<3072x128xf32>, vector<8x128xf32> -> vector<8x128xf32>
    %c0_3 = arith.constant 0 : index
    %c0_4 = arith.constant 0 : index
    %3 = vector.load %arg3[%c0_3, %c0_4] : memref<1x128xf32, #tpu.memory_space<vmem>>, vector<1x128xf32>
    %4 = vector.broadcast %3 : vector<1x128xf32> to vector<8x128xf32>
    %5 = arith.addf %2, %4 : vector<8x128xf32>
    %c0_5 = arith.constant 0 : index
    %c0_6 = arith.constant 0 : index
    %6 = vector.load %arg4[%c0_5, %c0_6] : memref<8x128xf32, #tpu.memory_space<vmem>>, vector<8x128xf32>
    tpu.vector_store %arg4[%c0_5, %c0_6], %5 {strides = array<i32>} : memref<8x128xf32, #tpu.memory_space<vmem>>, vector<8x128xf32>,
    return
  }
  func.func @transform_0(%arg0: i32) -> (i32, i32) {
    %c0_i32 = arith.constant 0 : i32
    %c0_i32_0 = arith.constant 0 : i32
    return %arg0, %c0_i32 : i32, i32
  }
  func.func @transform_1(%arg0: i32) -> (i32, i32) {
    %c0_i32 = arith.constant 0 : i32
    %c0_i32_0 = arith.constant 0 : i32
    %c0_i32_1 = arith.constant 0 : i32
    return %c0_i32, %c0_i32_0 : i32, i32
  }
  func.func @transform_2(%arg0: i32) -> (i32, i32) {
    %c0_i32 = arith.constant 0 : i32
    %c0_i32_0 = arith.constant 0 : i32
    %c0_i32_1 = arith.constant 0 : i32
    return %c0_i32, %c0_i32_0 : i32, i32
  }
  func.func @transform_3(%arg0: i32) -> (i32, i32) {
    %c0_i32 = arith.constant 0 : i32
    %c0_i32_0 = arith.constant 0 : i32
    return %arg0, %c0_i32 : i32, i32
  }
}

</mosaic_0001>

<bundles_post_ra>
// kernel: classifier_forward.1
= control target key start
LH: loop header
LB: loop body
LE: loop exit
PB: predicated region body
PF: predicated region fallthrough
CT: control target
= control target key end

     0   :  { %8 = vsyncpa [#allocation3], 0  ;;  %s2671_s0 = inlined_call_operand.hbm [shape: f32[2,3072], index: 0, kind: input, shape index: {}]   ;;  %s2672_s1 = inlined_call_operand.hbm [shape: f32[3072,128], index: 1, kind: input, shape index: {}]   ;;  %s2673_s2 = inlined_call_operand.hbm [shape: f32[1,128], index: 2, kind: input, shape index: {}]   ;;  %s2674_s3 = inlined_call_operand.vmem [shape: f32[8,128], index: 3, kind: output, shape index: {}]  }
   0x1   :  { %9 = vsyncpa [#allocation5], 0 }
   0x2   :  { %14 = vsyncadd [#allocation3], 2304  ;;  %s2498_s12 = smov [#allocation4]   ;;  %s2428_s16 = scalar_lea.hbm %s2672_s1, 49152 }
   0x3   :  { %s27_s13 = sshll.u32 %s2498_s12, 4  ;;  %p2429_p0 = scmp.ne.s32.totalorder %s2672_s1, %s2428_s16  ;;  %s28_s13 = int_to_ptr.vmem [resolvable:$true] %s27_s13 }
   0x4   :  { %p2432_p1 = scmp.lt.u32.totalorder %s2428_s16, %s2672_s1 }
   0x6   :  { %p2434_p2 = pnand %p2432_p1, %p2429_p0 }
   0x8   :  { %2437 = shalt.err (!%p2434_p2)
}
   0x9   :  { %s2438_s21 = scalar_lea.vmem %s28_s13, 49152  ;;  %p2443_p4 = scmp.lt.s32.totalorder %s28_s13, %s28_s13 }
   0xa   :  { %p2439_p3 = scmp.ne.s32.totalorder %s28_s13, %s2438_s21  ;;  %p2444_p5 = scmp.lt.s32.totalorder %s2438_s21, %s2438_s21 }
   0xc   :  { %p2445_p6 = por %p2444_p5, %p2443_p4 }
   0xe   :  { %p2446_p7 = pnand %p2445_p6, %p2439_p3 }
  0x10   :  { %2449 = shalt.err (!%p2446_p7)
}
  0x11   :  { %s2499_s22 = smov 128   ;;  %s2500_s23 = smov 8  }
  0x12   :  { %33 = dma.hbm_to_vmem [thread:$0]  %s2672_s1, 49152, %s28_s13, [#allocation5], %s2499_s22, %s2499_s22, %s2500_s23  }
  0x13   :  { %s2501_s26 = smov [#allocation2]   ;;  %s2450_s30 = scalar_lea.hbm %s2671_s0, 768 }
  0x14   :  { %s15_s27 = sshll.u32 %s2501_s26, 4  ;;  %p2451_p8 = scmp.ne.s32.totalorder %s2671_s0, %s2450_s30  ;;  %s16_s27 = int_to_ptr.vmem [resolvable:$true] %s15_s27 }
  0x15   :  { %p2454_p9 = scmp.lt.u32.totalorder %s2450_s30, %s2671_s0 }
  0x17   :  { %p2456_p10 = pnand %p2454_p9, %p2451_p8 }
  0x19   :  { %2459 = shalt.err (!%p2456_p10)
}
  0x1a   :  { %s2460_s8 = scalar_lea.vmem %s16_s27, 768  ;;  %s2464_s1 = scalar_lea.vmem %s16_s27, 3072 }
  0x1b   :  { %p2461_p11 = scmp.ne.s32.totalorder %s16_s27, %s2460_s8  ;;  %p2465_p12 = scmp.lt.s32.totalorder %s16_s27, %s16_s27 }
  0x1c   :  { %p2466_p13 = scmp.lt.s32.totalorder %s2464_s1, %s2460_s8 }
  0x1e   :  { %p2467_p0 = por %p2466_p13, %p2465_p12 }
  0x20   :  { %p2468_p1 = pnand %p2467_p0, %p2461_p11 }
  0x22   :  { %2471 = shalt.err (!%p2468_p1)
}
  0x23   :  { %s2502_s9 = smov 768   ;;  %s2503_s10 = smov 48  }
  0x24   :  { %21 = dma.hbm_to_vmem [thread:$0]  %s2671_s0, 768, %s16_s27, [#allocation3], %s2502_s9, %s2502_s9, %s2503_s10  }
  0x25   :  { %s2504_s13 = smov [#allocation6]   ;;  %s2472_s17 = scalar_lea.hbm %s2673_s2, 16 }
  0x26   :  { %s40_s14 = sshll.u32 %s2504_s13, 4  ;;  %p2473_p2 = scmp.ne.s32.totalorder %s2673_s2, %s2472_s17  ;;  %s41_s14 = int_to_ptr.vmem [resolvable:$true] %s40_s14 }
  0x27   :  { %p2476_p3 = scmp.lt.u32.totalorder %s2472_s17, %s2673_s2 }
  0x29   :  { %p2478_p4 = pnand %p2476_p3, %p2473_p2 }
  0x2b   :  { %2481 = shalt.err (!%p2478_p4)
}
  0x2c   :  { %s2482_s22 = scalar_lea.vmem %s41_s14, 16  ;;  %s2486_s0 = scalar_lea.vmem %s41_s14, 32 }
  0x2d   :  { %p2483_p5 = scmp.ne.s32.totalorder %s41_s14, %s2482_s22  ;;  %p2487_p6 = scmp.lt.s32.totalorder %s41_s14, %s41_s14 }
  0x2e   :  { %p2488_p7 = scmp.lt.s32.totalorder %s2486_s0, %s2482_s22 }
  0x30   :  { %p2489_p8 = por %p2488_p7, %p2487_p6 }
  0x32   :  { %p2490_p9 = pnand %p2489_p8, %p2483_p5 }
  0x34   :  { %2493 = shalt.err (!%p2490_p9)
}
  0x35   :  { %43 = dma.hbm_to_vmem [thread:$0]  %s2673_s2, 16, %s41_s14, [#allocation5]  }
  0x36   :  { %2494 = dma.done.wait [#allocation3], 3072  }
  0x37   :  { %2495 = vsyncadd [#allocation3], 4294964224 }
  0x38   :  { %2496 = dma.done.wait [#allocation5], 49168  }
  0x39   :  { %2497 = vsyncadd [#allocation5], 4294918128  ;;  %v93_v0 = vld [vmem:[#allocation4 + $0x80] sm:$0xff]  ;;  %v94_v1 = vld [vmem:[#allocation4 + $0x88] sm:$0xff]  ;;  %v2505_v51 = vmov 1983009808   ;;  %v499_v53 = vlaneseq }
  0x3a   :  { %v77_v2 = vld [vmem:[#allocation4] sm:$0xff]  ;;  %v2000_v3 = vpack.c.bf16 %v94_v1, %v93_v0  ;;  %v78_v4 = vld [vmem:[#allocation4 + $0x8] sm:$0xff]  ;;  %v95_v11 = vld [vmem:[#allocation4 + $0x90] sm:$0xff]  ;;  %v497_v52 = vunpack.c.l.s4 %v2505_v51 }
  0x3b   :  { %v125_v5 = vld [vmem:[#allocation4 + $0x180] sm:$0xff]  ;;  %v126_v6 = vld [vmem:[#allocation4 + $0x188] sm:$0xff]  ;;  %v2002_v7 = vpack.c.bf16 %v78_v4, %v77_v2  ;;  %v96_v13 = vld [vmem:[#allocation4 + $0x98] sm:$0xff] }
  0x3c   :  { %v2032_v8 = vpack.c.bf16 %v126_v6, %v125_v5  ;;  %v109_v9 = vld [vmem:[#allocation4 + $0x100] sm:$0xff]  ;;  %v110_v10 = vld [vmem:[#allocation4 + $0x108] sm:$0xff]  ;;  %2001 = vmatprep.subr.bf16.mxu0 %v2000_v3  ;;  %v79_v14 = vld [vmem:[#allocation4 + $0x10] sm:$0xff]  ;;  %v2004_v16 = vpack.c.bf16 %v96_v13, %v95_v11  ;;  %v498_v2 = vunpack.c.0.s8 %v497_v52  ;;  %v500_v3 = vshrl.u32 %v499_v53, 7 }
  0x3d   :  { %v2034_v12 = vpack.c.bf16 %v110_v10, %v109_v9  ;;  %v80_v15 = vld [vmem:[#allocation4 + $0x18] sm:$0xff]  ;;  %2003 = vmatpush3.bf16.msra.mxu0 %v2002_v7  ;;  %v127_v18 = vld [vmem:[#allocation4 + $0x190] sm:$0xff]  ;;  %v97_v23 = vld [vmem:[#allocation4 + $0xa0] sm:$0xff] }
  0x3e   :  { %2033 = vmatprep.subr.bf16.mxu1 %v2032_v8  ;;  %v2006_v17 = vpack.c.bf16 %v80_v15, %v79_v14  ;;  %v128_v19 = vld [vmem:[#allocation4 + $0x198] sm:$0xff]  ;;  %v111_v20 = vld [vmem:[#allocation4 + $0x110] sm:$0xff]  ;;  %v98_v24 = vld [vmem:[#allocation4 + $0xa8] sm:$0xff]  ;;  %2005 = vmatprep.subr.bf16.mxu0 %v2004_v16 }
  0x3f   :  { %2035 = vmatpush3.bf16.msra.mxu1 %v2034_v12  ;;  %v2036_v21 = vpack.c.bf16 %v128_v19, %v127_v18  ;;  %v112_v22 = vld [vmem:[#allocation4 + $0x118] sm:$0xff]  ;;  %v2008_v26 = vpack.c.bf16 %v98_v24, %v97_v23  ;;  %v81_v27 = vld [vmem:[#allocation4 + $0x20] sm:$0xff]  ;;  %v82_v28 = vld [vmem:[#allocation4 + $0x28] sm:$0xff] }
  0x40   :  { %v2038_v25 = vpack.c.bf16 %v112_v22, %v111_v20  ;;  %v129_v29 = vld [vmem:[#allocation4 + $0x1a0] sm:$0xff]  ;;  %v130_v30 = vld [vmem:[#allocation4 + $0x1a8] sm:$0xff]  ;;  %v2010_v33 = vpack.c.bf16 %v82_v28, %v81_v27  ;;  %v99_v35 = vld [vmem:[#allocation4 + $0xb0] sm:$0xff] }
  0x41   :  { %2037 = vmatprep.subr.bf16.mxu1 %v2036_v21  ;;  %v113_v31 = vld [vmem:[#allocation4 + $0x120] sm:$0xff]  ;;  %v114_v32 = vld [vmem:[#allocation4 + $0x128] sm:$0xff]  ;;  %2007 = vmatpush3.bf16.msra.mxu0 %v2006_v17  ;;  %v2040_v34 = vpack.c.bf16 %v130_v30, %v129_v29  ;;  %v100_v36 = vld [vmem:[#allocation4 + $0xb8] sm:$0xff]  ;;  %v2562_v21 = vsub.s32 %v498_v2, %v500_v3 }
  0x42   :  { %v83_v37 = vld [vmem:[#allocation4 + $0x30] sm:$0xff]  ;;  %2009 = vmatprep.subr.bf16.mxu0 %v2008_v26  ;;  %v2042_v38 = vpack.c.bf16 %v114_v32, %v113_v31  ;;  %v2012_v39 = vpack.c.bf16 %v100_v36, %v99_v35  ;;  %v84_v40 = vld [vmem:[#allocation4 + $0x38] sm:$0xff]  ;;  %v101_v46 = vld [vmem:[#allocation4 + $0xc0] sm:$0xff] }
  0x43   :  { %2039 = vmatpush3.bf16.msra.mxu1 %v2038_v25  ;;  %v131_v41 = vld [vmem:[#allocation4 + $0x1b0] sm:$0xff]  ;;  %v132_v42 = vld [vmem:[#allocation4 + $0x1b8] sm:$0xff]  ;;  %v102_v47 = vld [vmem:[#allocation4 + $0xc8] sm:$0xff]  ;;  %v2014_v48 = vpack.c.bf16 %v84_v40, %v83_v37 }
  0x44   :  { %2041 = vmatprep.subr.bf16.mxu1 %v2040_v34  ;;  %v2044_v43 = vpack.c.bf16 %v132_v42, %v131_v41  ;;  %v115_v44 = vld [vmem:[#allocation4 + $0x130] sm:$0xff]  ;;  %v116_v45 = vld [vmem:[#allocation4 + $0x138] sm:$0xff]  ;;  %v133_v49 = vld [vmem:[#allocation4 + $0x1c0] sm:$0xff]  ;;  %v2016_v55 = vpack.c.bf16 %v102_v47, %v101_v46 }
  0x45   :  { %2011 = vmatpush3.bf16.msra.mxu0 %v2010_v33  ;;  %v134_v50 = vld [vmem:[#allocation4 + $0x1c8] sm:$0xff]  ;;  %v2046_v54 = vpack.c.bf16 %v116_v45, %v115_v44  ;;  %v85_v56 = vld [vmem:[#allocation4 + $0x40] sm:$0xff]  ;;  %v103_v61 = vld [vmem:[#allocation4 + $0xd0] sm:$0xff] }
  0x46   :  { %2013 = vmatprep.subr.bf16.mxu0 %v2012_v39  ;;  %v86_v57 = vld [vmem:[#allocation4 + $0x48] sm:$0xff]  ;;  %v117_v58 = vld [vmem:[#allocation4 + $0x140] sm:$0xff]  ;;  %v2048_v59 = vpack.c.bf16 %v134_v50, %v133_v49  ;;  %v104_v62 = vld [vmem:[#allocation4 + $0xd8] sm:$0xff] }
  0x47   :  { %2043 = vmatpush3.bf16.msra.mxu1 %v2042_v38  ;;  %v118_v60 = vld [vmem:[#allocation4 + $0x148] sm:$0xff]  ;;  %v135_v63 = vld [vmem:[#allocation4 + $0x1d0] sm:$0xff]  ;;  %v136_v0 = vld [vmem:[#allocation4 + $0x1d8] sm:$0xff]  ;;  %v2018_v1 = vpack.c.bf16 %v86_v57, %v85_v56  ;;  %v2020_v5 = vpack.c.bf16 %v104_v62, %v103_v61 }
  0x48   :  { %2045 = vmatprep.subr.bf16.mxu1 %v2044_v43  ;;  %v2050_v4 = vpack.c.bf16 %v118_v60, %v117_v58  ;;  %v87_v6 = vld [vmem:[#allocation4 + $0x50] sm:$0xff]  ;;  %v88_v7 = vld [vmem:[#allocation4 + $0x58] sm:$0xff]  ;;  %v2052_v9 = vpack.c.bf16 %v136_v0, %v135_v63  ;;  %v105_v11 = vld [vmem:[#allocation4 + $0xe0] sm:$0xff] }
  0x49   :  { %2015 = vmatpush3.bf16.msra.mxu0 %v2014_v48  ;;  %v119_v8 = vld [vmem:[#allocation4 + $0x150] sm:$0xff]  ;;  %v120_v10 = vld [vmem:[#allocation4 + $0x158] sm:$0xff]  ;;  %v106_v12 = vld [vmem:[#allocation4 + $0xe8] sm:$0xff]  ;;  %v2022_v17 = vpack.c.bf16 %v88_v7, %v87_v6 }
  0x4a   :  { %2017 = vmatprep.subr.bf16.mxu0 %v2016_v55  ;;  %v89_v13 = vld [vmem:[#allocation4 + $0x60] sm:$0xff]  ;;  %v90_v14 = vld [vmem:[#allocation4 + $0x68] sm:$0xff]  ;;  %v107_v20 = vld [vmem:[#allocation4 + $0xf0] sm:$0xff]  ;;  %v2054_v22 = vpack.c.bf16 %v120_v10, %v119_v8  ;;  %v2024_v23 = vpack.c.bf16 %v106_v12, %v105_v11 }
  0x4b   :  { %2047 = vmatpush3.bf16.msra.mxu1 %v2046_v54  ;;  %v137_v15 = vld [vmem:[#allocation4 + $0x1e0] sm:$0xff]  ;;  %v138_v16 = vld [vmem:[#allocation4 + $0x1e8] sm:$0xff]  ;;  %v108_v24 = vld [vmem:[#allocation4 + $0xf8] sm:$0xff]  ;;  %v2026_v30 = vpack.c.bf16 %v90_v14, %v89_v13 }
  0x4c   :  { %2049 = vmatprep.subr.bf16.mxu1 %v2048_v59  ;;  %v121_v18 = vld [vmem:[#allocation4 + $0x160] sm:$0xff]  ;;  %v122_v19 = vld [vmem:[#allocation4 + $0x168] sm:$0xff]  ;;  %v2056_v25 = vpack.c.bf16 %v138_v16, %v137_v15  ;;  %v139_v27 = vld [vmem:[#allocation4 + $0x1f0] sm:$0xff]  ;;  %v2028_v35 = vpack.c.bf16 %v108_v24, %v107_v20 }
  0x4d   :  { %2019 = vmatpush3.bf16.msra.mxu0 %v2018_v1  ;;  %v2392_v26 = vld [vmem:[#allocation2] ss:$48 sps:$4 sm:$0xff]   ;;  %v140_v28 = vld [vmem:[#allocation4 + $0x1f8] sm:$0xff]  ;;  %v2396_v32 = vld [vmem:[#allocation2 + $0x4] ss:$48 sps:$4 sm:$0xff]   ;;  %v2058_v34 = vpack.c.bf16 %v122_v19, %v121_v18 }
  0x4e   :  { %2021 = vmatprep.subr.bf16.mxu0 %v2020_v5  ;;  %v2394_v29 = vld [vmem:[#allocation2 + $0x60] ss:$48 sps:$4 sm:$0xff]   ;;  %v502_v31 = vrot.slane %v2392_v26, %v2562_v21  ;;  %v2397_v33 = vld [vmem:[#allocation2 + $0x64] ss:$48 sps:$4 sm:$0xff]   ;;  %v92_v37 = vld [vmem:[#allocation4 + $0x78] sm:$0xff]  ;;  %v2060_v40 = vpack.c.bf16 %v140_v28, %v139_v27  ;;  %v509_v44 = vrot.slane %v2396_v32, %v2562_v21 }
  0x4f   :  { %2051 = vmatpush3.bf16.msra.mxu1 %v2050_v4  ;;  %v91_v36 = vld [vmem:[#allocation4 + $0x70] sm:$0xff]  ;;  %v516_v39 = vrot.slane %v2394_v29, %v2562_v21  ;;  %v124_v41 = vld [vmem:[#allocation4 + $0x178] sm:$0xff]  ;;  %v157_v42 = vld [vmem:[#allocation4 + $0x280] sm:$0xff]  ;;  %v523_v45 = vrot.slane %v2397_v33, %v2562_v21 }
  0x50   :  { %2053 = vmatprep.subr.bf16.mxu1 %v2052_v9  ;;  %v123_v38 = vld [vmem:[#allocation4 + $0x170] sm:$0xff]  ;;  %v158_v43 = vld [vmem:[#allocation4 + $0x288] sm:$0xff]  ;;  %v189_v47 = vld [vmem:[#allocation4 + $0x380] sm:$0xff]  ;;  %v2030_v49 = vpack.c.bf16 %v92_v37, %v91_v36 }
  0x51   :  { %2023 = vmatpush3.bf16.msra.mxu0 %v2022_v17  ;;  %v525_v46 = vcombine.high %v502_v31, %v516_v39  ;;  %v190_v48 = vld [vmem:[#allocation4 + $0x388] sm:$0xff]  ;;  %v527_v50 = vcombine.high %v509_v44, %v523_v45  ;;  %v2062_v51 = vpack.c.bf16 %v124_v41, %v123_v38  ;;  %v2064_v52 = vpack.c.bf16 %v158_v43, %v157_v42  ;;  %v141_v53 = vld [vmem:[#allocation4 + $0x200] sm:$0xff]  ;;  %v159_v58 = vld [vmem:[#allocation4 + $0x290] sm:$0xff] }
  0x52   :  { %2025 = vmatprep.subr.bf16.mxu0 %v2024_v23  ;;  %v142_v54 = vld [vmem:[#allocation4 + $0x208] sm:$0xff]  ;;  %v173_v55 = vld [vmem:[#allocation4 + $0x300] sm:$0xff]  ;;  %v2096_v56 = vpack.c.bf16 %v190_v48, %v189_v47  ;;  %v160_v59 = vld [vmem:[#allocation4 + $0x298] sm:$0xff]  ;;  %v524_v60 = vcombine.low %v502_v31, %v516_v39  ;;  %v526_v0 = vcombine.low %v509_v44, %v523_v45 }
  0x53   :  { %2055 = vmatpush3.bf16.msra.mxu1 %v2054_v22  ;;  %796 = vmatprep.mubr.f32.mxu0 %v525_v46  ;;  %v174_v57 = vld [vmem:[#allocation4 + $0x308] sm:$0xff]  ;;  %v191_v61 = vld [vmem:[#allocation4 + $0x390] sm:$0xff]  ;;  %v192_v62 = vld [vmem:[#allocation4 + $0x398] sm:$0xff]  ;;  %v2066_v63 = vpack.c.bf16 %v142_v54, %v141_v53  ;;  %v2068_v2 = vpack.c.bf16 %v160_v59, %v159_v58 }
  0x54   :  { %2057 = vmatprep.subr.bf16.mxu1 %v2056_v25  ;;  %866 = vmatprep.mubr.f32.mxu1 %v527_v50  ;;  %v2098_v1 = vpack.c.bf16 %v174_v57, %v173_v55  ;;  %v143_v3 = vld [vmem:[#allocation4 + $0x210] sm:$0xff]  ;;  %v144_v4 = vld [vmem:[#allocation4 + $0x218] sm:$0xff]  ;;  %v2100_v6 = vpack.c.bf16 %v192_v62, %v191_v61  ;;  %v161_v8 = vld [vmem:[#allocation4 + $0x2a0] sm:$0xff] }
  0x55   :  { %2027 = vmatpush3.bf16.msra.mxu0 %v2026_v30  ;;  %v175_v5 = vld [vmem:[#allocation4 + $0x310] sm:$0xff]  ;;  %v176_v7 = vld [vmem:[#allocation4 + $0x318] sm:$0xff]  ;;  %v162_v9 = vld [vmem:[#allocation4 + $0x2a8] sm:$0xff]  ;;  %v2070_v12 = vpack.c.bf16 %v144_v4, %v143_v3 }
  0x56   :  { %2029 = vmatprep.subr.bf16.mxu0 %v2028_v35  ;;  %v193_v10 = vld [vmem:[#allocation4 + $0x3a0] sm:$0xff]  ;;  %v194_v11 = vld [vmem:[#allocation4 + $0x3a8] sm:$0xff]  ;;  %v2102_v13 = vpack.c.bf16 %v176_v7, %v175_v5  ;;  %v2072_v14 = vpack.c.bf16 %v162_v9, %v161_v8  ;;  %v163_v20 = vld [vmem:[#allocation4 + $0x2b0] sm:$0xff] }
  0x57   :  { %2059 = vmatpush3.bf16.msra.mxu1 %v2058_v34  ;;  %v145_v15 = vld [vmem:[#allocation4 + $0x220] sm:$0xff]  ;;  %v146_v16 = vld [vmem:[#allocation4 + $0x228] sm:$0xff]  ;;  %v2104_v18 = vpack.c.bf16 %v194_v11, %v193_v10  ;;  %v164_v22 = vld [vmem:[#allocation4 + $0x2b8] sm:$0xff] }
  0x58   :  { %2061 = vmatprep.subr.bf16.mxu1 %v2060_v40  ;;  %v177_v17 = vld [vmem:[#allocation4 + $0x320] sm:$0xff]  ;;  %v178_v19 = vld [vmem:[#allocation4 + $0x328] sm:$0xff]  ;;  %v195_v23 = vld [vmem:[#allocation4 + $0x3b0] sm:$0xff]  ;;  %v2074_v25 = vpack.c.bf16 %v146_v16, %v145_v15  ;;  %v2076_v27 = vpack.c.bf16 %v164_v22, %v163_v20 }
  0x59   :  { %2031 = vmatpush3.bf16.msra.mxu0 %v2030_v49  ;;  %v196_v24 = vld [vmem:[#allocation4 + $0x3b8] sm:$0xff]  ;;  %v2106_v26 = vpack.c.bf16 %v178_v19, %v177_v17  ;;  %v147_v28 = vld [vmem:[#allocation4 + $0x230] sm:$0xff]  ;;  %v165_v33 = vld [vmem:[#allocation4 + $0x2c0] sm:$0xff] }
  0x5a   :  { %2065 = vmatprep.subr.bf16.mxu0 %v2064_v52  ;;  %v148_v29 = vld [vmem:[#allocation4 + $0x238] sm:$0xff]  ;;  %v179_v30 = vld [vmem:[#allocation4 + $0x330] sm:$0xff]  ;;  %v2108_v31 = vpack.c.bf16 %v196_v24, %v195_v23  ;;  %v166_v34 = vld [vmem:[#allocation4 + $0x2c8] sm:$0xff] }
  0x5b   :  { %2063 = vmatpush3.bf16.msra.mxu1 %v2062_v51  ;;  %v180_v32 = vld [vmem:[#allocation4 + $0x338] sm:$0xff]  ;;  %v149_v35 = vld [vmem:[#allocation4 + $0x240] sm:$0xff]  ;;  %v150_v36 = vld [vmem:[#allocation4 + $0x248] sm:$0xff]  ;;  %v2078_v39 = vpack.c.bf16 %v148_v29, %v147_v28  ;;  %v2080_v44 = vpack.c.bf16 %v166_v34, %v165_v33 }
  0x5c   :  { %2097 = vmatprep.subr.bf16.mxu1 %v2096_v56  ;;  %797 = vmatmul.mubr.f32.vlgmr.msra.gmra.mrb[0].mxu0 %v524_v60  ;;  %v197_v37 = vld [vmem:[#allocation4 + $0x3c0] sm:$0xff]  ;;  %v198_v38 = vld [vmem:[#allocation4 + $0x3c8] sm:$0xff]  ;;  %v167_v42 = vld [vmem:[#allocation4 + $0x2d0] sm:$0xff]  ;;  %v2110_v43 = vpack.c.bf16 %v180_v32, %v179_v30  ;;  %v2082_v51 = vpack.c.bf16 %v150_v36, %v149_v35 }
  0x5d   :  { %2067 = vmatpush3.bf16.msra.mxu0 %v2066_v63  ;;  %v181_v40 = vld [vmem:[#allocation4 + $0x340] sm:$0xff]  ;;  %v182_v41 = vld [vmem:[#allocation4 + $0x348] sm:$0xff]  ;;  %v168_v45 = vld [vmem:[#allocation4 + $0x2d8] sm:$0xff]  ;;  %v2112_v46 = vpack.c.bf16 %v198_v38, %v197_v37 }
  0x5e   :  { %867 = vmatmul.mubr.f32.vlgmr.msra.gmra.mrb[0].mxu1 %v526_v0  ;;  %2069 = vmatprep.subr.bf16.mxu0 %v2068_v2  ;;  %v2398_v47 = vld [vmem:[#allocation2 + $0x8] ss:$48 sps:$4 sm:$0xff]   ;;  %v199_v48 = vld [vmem:[#allocation4 + $0x3d0] sm:$0xff]  ;;  %v2402_v53 = vld [vmem:[#allocation2 + $0xc] ss:$48 sps:$4 sm:$0xff]   ;;  %v2114_v55 = vpack.c.bf16 %v182_v41, %v181_v40  ;;  %v2084_v56 = vpack.c.bf16 %v168_v45, %v167_v42 }
  0x5f   :  { %2099 = vmatpush3.bf16.msra.mxu1 %v2098_v1  ;;  %v200_v49 = vld [vmem:[#allocation4 + $0x3d8] sm:$0xff]  ;;  %v2569_v52 = vrot.slane %v2398_v47, %v2562_v21  ;;  %v151_v57 = vld [vmem:[#allocation4 + $0x250] sm:$0xff]  ;;  %v169_v63 = vld [vmem:[#allocation4 + $0x2e0] sm:$0xff]  ;;  %v2575_v1 = vrot.slane %v2402_v53, %v2562_v21 }
  0x60   :  { %2101 = vmatprep.subr.bf16.mxu1 %v2100_v6  ;;  %v2400_v50 = vld [vmem:[#allocation2 + $0x68] ss:$48 sps:$4 sm:$0xff]   ;;  %v2403_v54 = vld [vmem:[#allocation2 + $0x6c] ss:$48 sps:$4 sm:$0xff]   ;;  %v183_v59 = vld [vmem:[#allocation4 + $0x350] sm:$0xff]  ;;  %v2116_v61 = vpack.c.bf16 %v200_v49, %v199_v48 }
  0x61   :  { %2071 = vmatpush3.bf16.msra.mxu0 %v2070_v12  ;;  %v152_v58 = vld [vmem:[#allocation4 + $0x258] sm:$0xff]  ;;  %v2572_v60 = vrot.slane %v2400_v50, %v2562_v21  ;;  %v170_v0 = vld [vmem:[#allocation4 + $0x2e8] sm:$0xff]  ;;  %v2578_v2 = vrot.slane %v2403_v54, %v2562_v21  ;;  %v201_v3 = vld [vmem:[#allocation4 + $0x3e0] sm:$0xff] }
  0x62   :  { %2073 = vmatprep.subr.bf16.mxu0 %v2072_v14  ;;  %v184_v62 = vld [vmem:[#allocation4 + $0x358] sm:$0xff]  ;;  %v202_v4 = vld [vmem:[#allocation4 + $0x3e8] sm:$0xff]  ;;  %v2086_v6 = vpack.c.bf16 %v152_v58, %v151_v57  ;;  %v2088_v9 = vpack.c.bf16 %v170_v0, %v169_v63  ;;  %v153_v10 = vld [vmem:[#allocation4 + $0x260] sm:$0xff] }
  0x63   :  { %2103 = vmatpush3.bf16.msra.mxu1 %v2102_v13  ;;  %v561_v5 = vcombine.high %v2569_v52, %v2572_v60  ;;  %v563_v7 = vcombine.high %v2575_v1, %v2578_v2  ;;  %v2118_v8 = vpack.c.bf16 %v184_v62, %v183_v59  ;;  %v154_v11 = vld [vmem:[#allocation4 + $0x268] sm:$0xff]  ;;  %v185_v12 = vld [vmem:[#allocation4 + $0x360] sm:$0xff]  ;;  %v2120_v13 = vpack.c.bf16 %v202_v4, %v201_v3  ;;  %v171_v15 = vld [vmem:[#allocation4 + $0x2f0] sm:$0xff] }
  0x64   :  { %2105 = vmatprep.subr.bf16.mxu1 %v2104_v18  ;;  %v186_v14 = vld [vmem:[#allocation4 + $0x368] sm:$0xff]  ;;  %v172_v16 = vld [vmem:[#allocation4 + $0x2f8] sm:$0xff]  ;;  %v203_v17 = vld [vmem:[#allocation4 + $0x3f0] sm:$0xff]  ;;  %v2090_v19 = vpack.c.bf16 %v154_v11, %v153_v10  ;;  %v560_v42 = vcombine.low %v2569_v52, %v2572_v60 }
  0x65   :  { %2075 = vmatpush3.bf16.msra.mxu0 %v2074_v25  ;;  %936 = vmatprep.mubr.f32.mxu0 %v561_v5  ;;  %v204_v18 = vld [vmem:[#allocation4 + $0x3f8] sm:$0xff]  ;;  %v2122_v20 = vpack.c.bf16 %v186_v14, %v185_v12  ;;  %v2092_v22 = vpack.c.bf16 %v172_v16, %v171_v15  ;;  %v155_v23 = vld [vmem:[#allocation4 + $0x270] sm:$0xff]  ;;  %v221_v28 = vld [vmem:[#allocation4 + $0x480] sm:$0xff] }
  0x66   :  { %2077 = vmatprep.subr.bf16.mxu0 %v2076_v27  ;;  %1006 = vmatprep.mubr.f32.mxu1 %v563_v7  ;;  %v156_v24 = vld [vmem:[#allocation4 + $0x278] sm:$0xff]  ;;  %v187_v25 = vld [vmem:[#allocation4 + $0x370] sm:$0xff]  ;;  %v222_v29 = vld [vmem:[#allocation4 + $0x488] sm:$0xff] }
  0x67   :  { %2107 = vmatpush3.bf16.msra.mxu1 %v2106_v26  ;;  %v2124_v26 = vpack.c.bf16 %v204_v18, %v203_v17  ;;  %v188_v27 = vld [vmem:[#allocation4 + $0x378] sm:$0xff]  ;;  %v253_v30 = vld [vmem:[#allocation4 + $0x580] sm:$0xff]  ;;  %v2094_v32 = vpack.c.bf16 %v156_v24, %v155_v23  ;;  %v2128_v34 = vpack.c.bf16 %v222_v29, %v221_v28  ;;  %v206_v36 = vld [vmem:[#allocation4 + $0x408] sm:$0xff] }
  0x68   :  { %2109 = vmatprep.subr.bf16.mxu1 %v2108_v31  ;;  %v254_v31 = vld [vmem:[#allocation4 + $0x588] sm:$0xff]  ;;  %v2126_v33 = vpack.c.bf16 %v188_v27, %v187_v25  ;;  %v205_v35 = vld [vmem:[#allocation4 + $0x400] sm:$0xff]  ;;  %v223_v40 = vld [vmem:[#allocation4 + $0x490] sm:$0xff] }
  0x69   :  { %2079 = vmatpush3.bf16.msra.mxu0 %v2078_v39  ;;  %v237_v37 = vld [vmem:[#allocation4 + $0x500] sm:$0xff]  ;;  %v2160_v38 = vpack.c.bf16 %v254_v31, %v253_v30  ;;  %v238_v39 = vld [vmem:[#allocation4 + $0x508] sm:$0xff]  ;;  %v224_v41 = vld [vmem:[#allocation4 + $0x498] sm:$0xff]  ;;  %v2130_v45 = vpack.c.bf16 %v206_v36, %v205_v35 }
  0x6a   :  { %2081 = vmatprep.subr.bf16.mxu0 %v2080_v44  ;;  %v256_v44 = vld [vmem:[#allocation4 + $0x598] sm:$0xff]  ;;  %v2162_v47 = vpack.c.bf16 %v238_v39, %v237_v37  ;;  %v2132_v48 = vpack.c.bf16 %v224_v41, %v223_v40  ;;  %v207_v49 = vld [vmem:[#allocation4 + $0x410] sm:$0xff]  ;;  %v209_v52 = vld [vmem:[#allocation4 + $0x420] sm:$0xff] }
  0x6b   :  { %2111 = vmatpush3.bf16.msra.mxu1 %v2110_v43  ;;  %v255_v43 = vld [vmem:[#allocation4 + $0x590] sm:$0xff]  ;;  %v208_v50 = vld [vmem:[#allocation4 + $0x418] sm:$0xff]  ;;  %v210_v57 = vld [vmem:[#allocation4 + $0x428] sm:$0xff] }
  0x6c   :  { %2113 = vmatprep.subr.bf16.mxu1 %v2112_v46  ;;  %v562_v46 = vcombine.low %v2575_v1, %v2578_v2  ;;  %v2164_v53 = vpack.c.bf16 %v256_v44, %v255_v43  ;;  %v240_v54 = vld [vmem:[#allocation4 + $0x518] sm:$0xff]  ;;  %v257_v58 = vld [vmem:[#allocation4 + $0x5a0] sm:$0xff]  ;;  %v258_v59 = vld [vmem:[#allocation4 + $0x5a8] sm:$0xff]  ;;  %v2134_v60 = vpack.c.bf16 %v208_v50, %v207_v49 }
  0x6d   :  { %2083 = vmatpush3.bf16.msra.mxu0 %v2082_v51  ;;  %v239_v51 = vld [vmem:[#allocation4 + $0x510] sm:$0xff]  ;;  %v242_v62 = vld [vmem:[#allocation4 + $0x528] sm:$0xff]  ;;  %v228_v2 = vld [vmem:[#allocation4 + $0x4b8] sm:$0xff]  ;;  %v2168_v3 = vpack.c.bf16 %v258_v59, %v257_v58 }
  0x6e   :  { %2085 = vmatprep.subr.bf16.mxu0 %v2084_v56  ;;  %v226_v56 = vld [vmem:[#allocation4 + $0x4a8] sm:$0xff]  ;;  %v227_v63 = vld [vmem:[#allocation4 + $0x4b0] sm:$0xff]  ;;  %v2166_v0 = vpack.c.bf16 %v240_v54, %v239_v51  ;;  %v212_v15 = vld [vmem:[#allocation4 + $0x438] sm:$0xff] }
  0x6f   :  { %2115 = vmatpush3.bf16.msra.mxu1 %v2114_v55  ;;  %v225_v55 = vld [vmem:[#allocation4 + $0x4a0] sm:$0xff]  ;;  %v259_v5 = vld [vmem:[#allocation4 + $0x5b0] sm:$0xff]  ;;  %v246_v36 = vld [vmem:[#allocation4 + $0x548] sm:$0xff] }
  0x70   :  { %2117 = vmatprep.subr.bf16.mxu1 %v2116_v61  ;;  %v241_v61 = vld [vmem:[#allocation4 + $0x520] sm:$0xff]  ;;  %v2136_v1 = vpack.c.bf16 %v226_v56, %v225_v55  ;;  %v211_v14 = vld [vmem:[#allocation4 + $0x430] sm:$0xff]  ;;  %v264_v40 = vld [vmem:[#allocation4 + $0x5d8] sm:$0xff] }
  0x71   :  { %2087 = vmatpush3.bf16.msra.mxu0 %v2086_v6  ;;  %v2404_v4 = vld [vmem:[#allocation2 + $0x10] ss:$48 sps:$4 sm:$0xff]   ;;  %v260_v6 = vld [vmem:[#allocation4 + $0x5b8] sm:$0xff]  ;;  %v2408_v10 = vld [vmem:[#allocation2 + $0x14] ss:$48 sps:$4 sm:$0xff]   ;;  %v2170_v12 = vpack.c.bf16 %v242_v62, %v241_v61  ;;  %v2142_v28 = vpack.c.bf16 %v212_v15, %v211_v14 }
  0x72   :  { %2089 = vmatprep.subr.bf16.mxu0 %v2088_v9  ;;  %v2406_v7 = vld [vmem:[#allocation2 + $0x70] ss:$48 sps:$4 sm:$0xff]   ;;  %v2589_v9 = vrot.slane %v2404_v4, %v2562_v21  ;;  %v2409_v11 = vld [vmem:[#allocation2 + $0x74] ss:$48 sps:$4 sm:$0xff]   ;;  %v2172_v18 = vpack.c.bf16 %v260_v6, %v259_v5  ;;  %v2595_v23 = vrot.slane %v2408_v10, %v2562_v21  ;;  %v234_v50 = vld [vmem:[#allocation4 + $0x4e8] sm:$0xff] }
  0x73   :  { %2119 = vmatpush3.bf16.msra.mxu1 %v2118_v8  ;;  %v2138_v8 = vpack.c.bf16 %v210_v57, %v209_v52  ;;  %v243_v16 = vld [vmem:[#allocation4 + $0x530] sm:$0xff]  ;;  %v2592_v17 = vrot.slane %v2406_v7, %v2562_v21  ;;  %v2598_v24 = vrot.slane %v2409_v11, %v2562_v21  ;;  %v261_v25 = vld [vmem:[#allocation4 + $0x5c0] sm:$0xff]  ;;  %v218_v57 = vld [vmem:[#allocation4 + $0x468] sm:$0xff] }
  0x74   :  { %2121 = vmatprep.subr.bf16.mxu1 %v2120_v13  ;;  %v2140_v13 = vpack.c.bf16 %v228_v2, %v227_v63  ;;  %v231_v37 = vld [vmem:[#allocation4 + $0x4d0] sm:$0xff]  ;;  %v233_v49 = vld [vmem:[#allocation4 + $0x4e0] sm:$0xff]  ;;  %v236_v62 = vld [vmem:[#allocation4 + $0x4f8] sm:$0xff] }
  0x75   :  { %2091 = vmatpush3.bf16.msra.mxu0 %v2090_v19  ;;  %v244_v19 = vld [vmem:[#allocation4 + $0x538] sm:$0xff]  ;;  %v597_v27 = vcombine.high %v2589_v9, %v2592_v17  ;;  %v599_v29 = vcombine.high %v2595_v23, %v2598_v24  ;;  %v263_v39 = vld [vmem:[#allocation4 + $0x5d0] sm:$0xff]  ;;  %v265_v51 = vld [vmem:[#allocation4 + $0x5e0] sm:$0xff]  ;;  %v2152_v56 = vpack.c.bf16 %v234_v50, %v233_v49 }
  0x76   :  { %2093 = vmatprep.subr.bf16.mxu0 %v2092_v22  ;;  %v230_v22 = vld [vmem:[#allocation4 + $0x4c8] sm:$0xff]  ;;  %v2174_v30 = vpack.c.bf16 %v244_v19, %v243_v16  ;;  %v215_v44 = vld [vmem:[#allocation4 + $0x450] sm:$0xff]  ;;  %v217_v52 = vld [vmem:[#allocation4 + $0x460] sm:$0xff] }
  0x77   :  { %2123 = vmatpush3.bf16.msra.mxu1 %v2122_v20  ;;  %v229_v20 = vld [vmem:[#allocation4 + $0x4c0] sm:$0xff]  ;;  %v235_v61 = vld [vmem:[#allocation4 + $0x4f0] sm:$0xff]  ;;  %v220_v5 = vld [vmem:[#allocation4 + $0x478] sm:$0xff] }
  0x78   :  { %2125 = vmatprep.subr.bf16.mxu1 %v2124_v26  ;;  %v262_v26 = vld [vmem:[#allocation4 + $0x5c8] sm:$0xff]  ;;  %v2144_v31 = vpack.c.bf16 %v230_v22, %v229_v20  ;;  %v249_v58 = vld [vmem:[#allocation4 + $0x560] sm:$0xff]  ;;  %v267_v63 = vld [vmem:[#allocation4 + $0x5f0] sm:$0xff] }
  0x79   :  { %2095 = vmatpush3.bf16.msra.mxu0 %v2094_v32  ;;  %v213_v32 = vld [vmem:[#allocation4 + $0x440] sm:$0xff]  ;;  %v2176_v35 = vpack.c.bf16 %v262_v26, %v261_v25  ;;  %v219_v4 = vld [vmem:[#allocation4 + $0x470] sm:$0xff]  ;;  %v286_v11 = vld [vmem:[#allocation4 + $0x688] sm:$0xff] }
  0x7a   :  { %2129 = vmatprep.subr.bf16.mxu0 %v2128_v34  ;;  %v245_v34 = vld [vmem:[#allocation4 + $0x540] sm:$0xff]  ;;  %v251_v6 = vld [vmem:[#allocation4 + $0x570] sm:$0xff]  ;;  %v318_v15 = vld [vmem:[#allocation4 + $0x788] sm:$0xff]  ;;  %v2158_v16 = vpack.c.bf16 %v220_v5, %v219_v4 }
  0x7b   :  { %2127 = vmatpush3.bf16.msra.mxu1 %v2126_v33  ;;  %v214_v33 = vld [vmem:[#allocation4 + $0x448] sm:$0xff]  ;;  %v285_v10 = vld [vmem:[#allocation4 + $0x680] sm:$0xff]  ;;  %v287_v20 = vld [vmem:[#allocation4 + $0x690] sm:$0xff] }
  0x7c   :  { %2161 = vmatprep.subr.bf16.mxu1 %v2160_v38  ;;  %937 = vmatmul.mubr.f32.vlgmr.msra.gmra.mrb[2].mxu0 %v560_v42  ;;  %v232_v38 = vld [vmem:[#allocation4 + $0x4d8] sm:$0xff]  ;;  %v2146_v41 = vpack.c.bf16 %v214_v33, %v213_v32  ;;  %v2178_v42 = vpack.c.bf16 %v246_v36, %v245_v34  ;;  %v317_v14 = vld [vmem:[#allocation4 + $0x780] sm:$0xff]  ;;  %v302_v19 = vld [vmem:[#allocation4 + $0x708] sm:$0xff]  ;;  %v2192_v25 = vpack.c.bf16 %v286_v11, %v285_v10 }
  0x7d   :  { %2131 = vmatpush3.bf16.msra.mxu0 %v2130_v45  ;;  %1076 = vmatprep.mubr.f32.mxu0 %v597_v27  ;;  %v2148_v43 = vpack.c.bf16 %v232_v38, %v231_v37  ;;  %v216_v45 = vld [vmem:[#allocation4 + $0x458] sm:$0xff]  ;;  %v2224_v27 = vpack.c.bf16 %v318_v15, %v317_v14  ;;  %v598_v34 = vcombine.low %v2595_v23, %v2598_v24  ;;  %v290_v23 = vld [vmem:[#allocation4 + $0x6a8] sm:$0xff]  ;;  %v277_v14 = vld [vmem:[#allocation4 + $0x640] sm:$0xff] }
  0x7e   :  { %1007 = vmatmul.mubr.f32.vlgmr.msra.gmra.mrb[2].mxu1 %v562_v46  ;;  %2133 = vmatprep.subr.bf16.mxu0 %v2132_v48  ;;  %v247_v46 = vld [vmem:[#allocation4 + $0x550] sm:$0xff]  ;;  %v248_v48 = vld [vmem:[#allocation4 + $0x558] sm:$0xff]  ;;  %v2150_v54 = vpack.c.bf16 %v216_v45, %v215_v44  ;;  %v289_v44 = vld [vmem:[#allocation4 + $0x6a0] sm:$0xff] }
  0x7f   :  { %2163 = vmatpush3.bf16.msra.mxu1 %v2162_v47  ;;  %1146 = vmatprep.mubr.f32.mxu1 %v599_v29  ;;  %v2180_v47 = vpack.c.bf16 %v264_v40, %v263_v39  ;;  %v2182_v55 = vpack.c.bf16 %v248_v48, %v247_v46  ;;  %v288_v26 = vld [vmem:[#allocation4 + $0x698] sm:$0xff]  ;;  %v596_v29 = vcombine.low %v2589_v9, %v2592_v17  ;;  %v271_v40 = vld [vmem:[#allocation4 + $0x610] sm:$0xff]  ;;  %v321_v46 = vld [vmem:[#allocation4 + $0x7a0] sm:$0xff] }
  0x80   :  { %2165 = vmatprep.subr.bf16.mxu1 %v2164_v53  ;;  %v266_v53 = vld [vmem:[#allocation4 + $0x5e8] sm:$0xff]  ;;  %v2196_v39 = vpack.c.bf16 %v288_v26, %v287_v20  ;;  %v303_v9 = vld [vmem:[#allocation4 + $0x710] sm:$0xff]  ;;  %v308_v5 = vld [vmem:[#allocation4 + $0x738] sm:$0xff] }
  0x81   :  { %2135 = vmatpush3.bf16.msra.mxu0 %v2134_v60  ;;  %v2184_v59 = vpack.c.bf16 %v266_v53, %v265_v51  ;;  %v250_v60 = vld [vmem:[#allocation4 + $0x568] sm:$0xff]  ;;  %v2200_v53 = vpack.c.bf16 %v290_v23, %v289_v44  ;;  %v295_v20 = vld [vmem:[#allocation4 + $0x6d0] sm:$0xff]  ;;  %v328_v26 = vld [vmem:[#allocation4 + $0x7d8] sm:$0xff] }
  0x82   :  { %2137 = vmatprep.subr.bf16.mxu0 %v2136_v1  ;;  %v2154_v1 = vpack.c.bf16 %v218_v57, %v217_v52  ;;  %v2186_v2 = vpack.c.bf16 %v250_v60, %v249_v58  ;;  %v2412_v32 = vld [vmem:[#allocation2 + $0x78] ss:$48 sps:$4 sm:$0xff]   ;;  %v2414_v36 = vld [vmem:[#allocation2 + $0x1c] ss:$48 sps:$4 sm:$0xff]   ;;  %v291_v58 = vld [vmem:[#allocation4 + $0x6b0] sm:$0xff] }
  0x83   :  { %2167 = vmatpush3.bf16.msra.mxu1 %v2166_v0  ;;  %v268_v0 = vld [vmem:[#allocation4 + $0x5f8] sm:$0xff]  ;;  %v2612_v17 = vrot.slane %v2412_v32, %v2562_v21  ;;  %v2615_v24 = vrot.slane %v2414_v36, %v2562_v21  ;;  %v306_v57 = vld [vmem:[#allocation4 + $0x728] sm:$0xff]  ;;  %v323_v60 = vld [vmem:[#allocation4 + $0x7b0] sm:$0xff] }
  0x84   :  { %2169 = vmatprep.subr.bf16.mxu1 %v2168_v3  ;;  %v2156_v3 = vpack.c.bf16 %v236_v62, %v235_v61  ;;  %v2188_v7 = vpack.c.bf16 %v268_v0, %v267_v63  ;;  %v2415_v37 = vld [vmem:[#allocation2 + $0x7c] ss:$48 sps:$4 sm:$0xff]   ;;  %v311_v32 = vld [vmem:[#allocation4 + $0x750] sm:$0xff]  ;;  %v297_v36 = vld [vmem:[#allocation4 + $0x6e0] sm:$0xff] }
  0x85   :  { %2139 = vmatpush3.bf16.msra.mxu0 %v2138_v8  ;;  %v252_v8 = vld [vmem:[#allocation4 + $0x578] sm:$0xff]  ;;  %v2618_v45 = vrot.slane %v2415_v37, %v2562_v21  ;;  %v326_v10 = vld [vmem:[#allocation4 + $0x7c8] sm:$0xff] }
  0x86   :  { %2141 = vmatprep.subr.bf16.mxu0 %v2140_v13  ;;  %v270_v13 = vld [vmem:[#allocation4 + $0x608] sm:$0xff]  ;;  %v2190_v22 = vpack.c.bf16 %v252_v8, %v251_v6  ;;  %v324_v61 = vld [vmem:[#allocation4 + $0x7b8] sm:$0xff]  ;;  %v293_v6 = vld [vmem:[#allocation4 + $0x6c0] sm:$0xff] }
  0x87   :  { %2171 = vmatpush3.bf16.msra.mxu1 %v2170_v12  ;;  %v269_v12 = vld [vmem:[#allocation4 + $0x600] sm:$0xff]  ;;  %v635_v50 = vcombine.high %v2615_v24, %v2618_v45  ;;  %v2236_v4 = vpack.c.bf16 %v324_v61, %v323_v60  ;;  %v278_v15 = vld [vmem:[#allocation4 + $0x648] sm:$0xff] }
  0x88   :  { %2173 = vmatprep.subr.bf16.mxu1 %v2172_v18  ;;  %v301_v18 = vld [vmem:[#allocation4 + $0x700] sm:$0xff]  ;;  %v2194_v33 = vpack.c.bf16 %v270_v13, %v269_v12  ;;  %v298_v37 = vld [vmem:[#allocation4 + $0x6e8] sm:$0xff] }
  0x89   :  { %2143 = vmatpush3.bf16.msra.mxu0 %v2142_v28  ;;  %v2410_v28 = vld [vmem:[#allocation2 + $0x18] ss:$48 sps:$4 sm:$0xff]   ;;  %v2226_v38 = vpack.c.bf16 %v302_v19, %v301_v18  ;;  %v325_v8 = vld [vmem:[#allocation4 + $0x7c0] sm:$0xff]  ;;  %v2216_v23 = vpack.c.bf16 %v298_v37, %v297_v36 }
  0x8a   :  { %2145 = vmatprep.subr.bf16.mxu0 %v2144_v31  ;;  %v320_v31 = vld [vmem:[#allocation4 + $0x798] sm:$0xff]  ;;  %v2240_v18 = vpack.c.bf16 %v326_v10, %v325_v8  ;;  %v310_v19 = vld [vmem:[#allocation4 + $0x748] sm:$0xff]  ;;  %v381_v61 = vld [vmem:[#allocation4 + $0x980] sm:$0xff] }
  0x8b   :  { %2175 = vmatpush3.bf16.msra.mxu1 %v2174_v30  ;;  %v319_v30 = vld [vmem:[#allocation4 + $0x790] sm:$0xff]  ;;  %v365_v8 = vld [vmem:[#allocation4 + $0x900] sm:$0xff]  ;;  %v386_v37 = vld [vmem:[#allocation4 + $0x9a8] sm:$0xff] }
  0x8c   :  { %2177 = vmatprep.subr.bf16.mxu1 %v2176_v35  ;;  %v2609_v35 = vrot.slane %v2410_v28, %v2562_v21  ;;  %v385_v36 = vld [vmem:[#allocation4 + $0x9a0] sm:$0xff] }
  0x8d   :  { %2147 = vmatpush3.bf16.msra.mxu0 %v2146_v41  ;;  %v272_v41 = vld [vmem:[#allocation4 + $0x618] sm:$0xff] }
  0x8e   :  { %2149 = vmatprep.subr.bf16.mxu0 %v2148_v43  ;;  %v304_v43 = vld [vmem:[#allocation4 + $0x718] sm:$0xff]  ;;  %v633_v48 = vcombine.high %v2609_v35, %v2612_v17  ;;  %v2198_v49 = vpack.c.bf16 %v272_v41, %v271_v40  ;;  %v330_v40 = vld [vmem:[#allocation4 + $0x7e8] sm:$0xff] }
  0x8f   :  { %2179 = vmatpush3.bf16.msra.mxu1 %v2178_v42  ;;  %v2228_v42 = vpack.c.bf16 %v320_v31, %v319_v30  ;;  %v2230_v51 = vpack.c.bf16 %v304_v43, %v303_v9  ;;  %v279_v30 = vld [vmem:[#allocation4 + $0x650] sm:$0xff]  ;;  %v280_v31 = vld [vmem:[#allocation4 + $0x658] sm:$0xff]  ;;  %v282_v9 = vld [vmem:[#allocation4 + $0x668] sm:$0xff] }
  0x90   :  { %2181 = vmatprep.subr.bf16.mxu1 %v2180_v47  ;;  %v322_v47 = vld [vmem:[#allocation4 + $0x7a8] sm:$0xff]  ;;  %v2214_v41 = vpack.c.bf16 %v280_v31, %v279_v30  ;;  %v336_v30 = vld [vmem:[#allocation4 + $0x818] sm:$0xff] }
  0x91   :  { %2151 = vmatpush3.bf16.msra.mxu0 %v2150_v54  ;;  %v273_v54 = vld [vmem:[#allocation4 + $0x620] sm:$0xff]  ;;  %v2232_v52 = vpack.c.bf16 %v322_v47, %v321_v46  ;;  %v314_v43 = vld [vmem:[#allocation4 + $0x768] sm:$0xff]  ;;  %v299_v46 = vld [vmem:[#allocation4 + $0x6f0] sm:$0xff] }
  0x92   :  { %2153 = vmatprep.subr.bf16.mxu0 %v2152_v56  ;;  %v305_v56 = vld [vmem:[#allocation4 + $0x720] sm:$0xff]  ;;  %v368_v31 = vld [vmem:[#allocation4 + $0x918] sm:$0xff] }
  0x93   :  { %2183 = vmatpush3.bf16.msra.mxu1 %v2182_v55  ;;  %v274_v55 = vld [vmem:[#allocation4 + $0x628] sm:$0xff]  ;;  %v2234_v63 = vpack.c.bf16 %v306_v57, %v305_v56  ;;  %v316_v57 = vld [vmem:[#allocation4 + $0x778] sm:$0xff] }
  0x94   :  { %2185 = vmatprep.subr.bf16.mxu1 %v2184_v59  ;;  %v292_v59 = vld [vmem:[#allocation4 + $0x6b8] sm:$0xff]  ;;  %v2202_v62 = vpack.c.bf16 %v274_v55, %v273_v54  ;;  %v315_v55 = vld [vmem:[#allocation4 + $0x770] sm:$0xff] }
  0x95   :  { %2155 = vmatpush3.bf16.msra.mxu0 %v2154_v1  ;;  %v2204_v0 = vpack.c.bf16 %v292_v59, %v291_v58  ;;  %v275_v1 = vld [vmem:[#allocation4 + $0x630] sm:$0xff]  ;;  %v284_v54 = vld [vmem:[#allocation4 + $0x678] sm:$0xff]  ;;  %v349_v58 = vld [vmem:[#allocation4 + $0x880] sm:$0xff] }
  0x96   :  { %2157 = vmatprep.subr.bf16.mxu0 %v2156_v3  ;;  %v307_v3 = vld [vmem:[#allocation4 + $0x730] sm:$0xff]  ;;  %v350_v59 = vld [vmem:[#allocation4 + $0x888] sm:$0xff] }
  0x97   :  { %2187 = vmatpush3.bf16.msra.mxu1 %v2186_v2  ;;  %v276_v2 = vld [vmem:[#allocation4 + $0x638] sm:$0xff]  ;;  %v2238_v12 = vpack.c.bf16 %v308_v5, %v307_v3  ;;  %v2256_v5 = vpack.c.bf16 %v350_v59, %v349_v58  ;;  %v341_v58 = vld [vmem:[#allocation4 + $0x840] sm:$0xff] }
  0x98   :  { %2189 = vmatprep.subr.bf16.mxu1 %v2188_v7  ;;  %v294_v7 = vld [vmem:[#allocation4 + $0x6c8] sm:$0xff]  ;;  %v2206_v11 = vpack.c.bf16 %v276_v2, %v275_v1  ;;  %v2420_v1 = vld [vmem:[#allocation2 + $0x24] ss:$48 sps:$4 sm:$0xff]  }
  0x99   :  { %2159 = vmatpush3.bf16.msra.mxu0 %v2158_v16  ;;  %v2208_v13 = vpack.c.bf16 %v294_v7, %v293_v6  ;;  %v309_v16 = vld [vmem:[#allocation4 + $0x740] sm:$0xff]  ;;  %v334_v7 = vld [vmem:[#allocation4 + $0x808] sm:$0xff] }
  0x9a   :  { %2193 = vmatprep.subr.bf16.mxu0 %v2192_v25  ;;  %v327_v25 = vld [vmem:[#allocation4 + $0x7d0] sm:$0xff]  ;;  %v2242_v28 = vpack.c.bf16 %v310_v19, %v309_v16  ;;  %v333_v6 = vld [vmem:[#allocation4 + $0x800] sm:$0xff]  ;;  %v632_v16 = vcombine.low %v2609_v35, %v2612_v17  ;;  %v384_v19 = vld [vmem:[#allocation4 + $0x998] sm:$0xff] }
  0x9b   :  { %2191 = vmatpush3.bf16.msra.mxu1 %v2190_v22  ;;  %v296_v22 = vld [vmem:[#allocation4 + $0x6d8] sm:$0xff]  ;;  %v2421_v2 = vld [vmem:[#allocation2 + $0x84] ss:$48 sps:$4 sm:$0xff]  }
  0x9c   :  { %2225 = vmatprep.subr.bf16.mxu1 %v2224_v27  ;;  %1077 = vmatmul.mubr.f32.vlgmr.msra.gmra.mrb[4].mxu0 %v596_v29  ;;  %v2210_v27 = vpack.c.bf16 %v278_v15, %v277_v14  ;;  %v2212_v29 = vpack.c.bf16 %v296_v22, %v295_v20  ;;  %v2633_v20 = vrot.slane %v2420_v1, %v2562_v21  ;;  %v367_v35 = vld [vmem:[#allocation4 + $0x910] sm:$0xff]  ;;  %v389_v59 = vld [vmem:[#allocation4 + $0x9c0] sm:$0xff] }
  0x9d   :  { %2195 = vmatpush3.bf16.msra.mxu0 %v2194_v33  ;;  %1216 = vmatprep.mubr.f32.mxu0 %v633_v48  ;;  %v2244_v33 = vpack.c.bf16 %v328_v26, %v327_v25  ;;  %v300_v48 = vld [vmem:[#allocation4 + $0x6f8] sm:$0xff]  ;;  %v2636_v22 = vrot.slane %v2421_v2, %v2562_v21  ;;  %v2258_v25 = vpack.c.bf16 %v334_v7, %v333_v6  ;;  %v391_v6 = vld [vmem:[#allocation4 + $0x9d0] sm:$0xff] }
  0x9e   :  { %1147 = vmatmul.mubr.f32.vlgmr.msra.gmra.mrb[4].mxu1 %v598_v34  ;;  %2197 = vmatprep.subr.bf16.mxu0 %v2196_v39  ;;  %v312_v34 = vld [vmem:[#allocation4 + $0x758] sm:$0xff]  ;;  %v329_v39 = vld [vmem:[#allocation4 + $0x7e0] sm:$0xff]  ;;  %v634_v26 = vcombine.low %v2615_v24, %v2618_v45 }
  0x9f   :  { %2227 = vmatpush3.bf16.msra.mxu1 %v2226_v38  ;;  %1286 = vmatprep.mubr.f32.mxu1 %v635_v50  ;;  %v281_v38 = vld [vmem:[#allocation4 + $0x660] sm:$0xff]  ;;  %v2246_v44 = vpack.c.bf16 %v312_v34, %v311_v32  ;;  %v2248_v47 = vpack.c.bf16 %v330_v40, %v329_v39  ;;  %v332_v50 = vld [vmem:[#allocation4 + $0x7f8] sm:$0xff]  ;;  %v671_v24 = vcombine.high %v2633_v20, %v2636_v22 }
  0xa0   :  { %2229 = vmatprep.subr.bf16.mxu1 %v2228_v42  ;;  %v313_v42 = vld [vmem:[#allocation4 + $0x760] sm:$0xff]  ;;  %v392_v7 = vld [vmem:[#allocation4 + $0x9d8] sm:$0xff] }
  0xa1   :  { %2199 = vmatpush3.bf16.msra.mxu0 %v2198_v49  ;;  %v331_v49 = vld [vmem:[#allocation4 + $0x7f0] sm:$0xff]  ;;  %v2250_v56 = vpack.c.bf16 %v314_v43, %v313_v42  ;;  %v353_v32 = vld [vmem:[#allocation4 + $0x8a0] sm:$0xff]  ;;  %v2296_v42 = vpack.c.bf16 %v386_v37, %v385_v36  ;;  %v370_v43 = vld [vmem:[#allocation4 + $0x928] sm:$0xff] }
  0xa2   :  { %2201 = vmatprep.subr.bf16.mxu0 %v2200_v53  ;;  %v283_v53 = vld [vmem:[#allocation4 + $0x670] sm:$0xff]  ;;  %v2252_v60 = vpack.c.bf16 %v332_v50, %v331_v49  ;;  %v337_v40 = vld [vmem:[#allocation4 + $0x820] sm:$0xff]  ;;  %v364_v37 = vld [vmem:[#allocation4 + $0x8f8] sm:$0xff] }
  0xa3   :  { %2231 = vmatpush3.bf16.msra.mxu1 %v2230_v51  ;;  %v2218_v51 = vpack.c.bf16 %v282_v9, %v281_v38  ;;  %v2222_v3 = vpack.c.bf16 %v284_v54, %v283_v53  ;;  %v2294_v38 = vpack.c.bf16 %v368_v31, %v367_v35  ;;  %v369_v9 = vld [vmem:[#allocation4 + $0x920] sm:$0xff]  ;;  %v340_v53 = vld [vmem:[#allocation4 + $0x838] sm:$0xff]  ;;  %v371_v54 = vld [vmem:[#allocation4 + $0x930] sm:$0xff] }
  0xa4   :  { %2233 = vmatprep.subr.bf16.mxu1 %v2232_v52  ;;  %v2220_v52 = vpack.c.bf16 %v300_v48, %v299_v46  ;;  %v387_v46 = vld [vmem:[#allocation4 + $0x9b0] sm:$0xff]  ;;  %v2298_v49 = vpack.c.bf16 %v370_v43, %v369_v9  ;;  %v346_v31 = vld [vmem:[#allocation4 + $0x868] sm:$0xff]  ;;  %v380_v43 = vld [vmem:[#allocation4 + $0x978] sm:$0xff] }
  0xa5   :  { %2203 = vmatpush3.bf16.msra.mxu0 %v2202_v62  ;;  %v2416_v62 = vld [vmem:[#allocation2 + $0x20] ss:$48 sps:$4 sm:$0xff]  }
  0xa6   :  { %2205 = vmatprep.subr.bf16.mxu0 %v2204_v0  ;;  %v382_v0 = vld [vmem:[#allocation4 + $0x988] sm:$0xff]  ;;  %v2625_v14 = vrot.slane %v2416_v62, %v2562_v21  ;;  %v363_v36 = vld [vmem:[#allocation4 + $0x8f0] sm:$0xff] }
  0xa7   :  { %2235 = vmatpush3.bf16.msra.mxu1 %v2234_v63  ;;  %v2418_v63 = vld [vmem:[#allocation2 + $0x80] ss:$48 sps:$4 sm:$0xff]   ;;  %v2288_v10 = vpack.c.bf16 %v382_v0, %v381_v61  ;;  %v342_v62 = vld [vmem:[#allocation4 + $0x848] sm:$0xff] }
  0xa8   :  { %2237 = vmatprep.subr.bf16.mxu1 %v2236_v4  ;;  %v2254_v4 = vpack.c.bf16 %v316_v57, %v315_v55  ;;  %v2628_v15 = vrot.slane %v2418_v63, %v2562_v21  ;;  %v358_v57 = vld [vmem:[#allocation4 + $0x8c8] sm:$0xff]  ;;  %v373_v63 = vld [vmem:[#allocation4 + $0x940] sm:$0xff] }
  0xa9   :  { %2207 = vmatpush3.bf16.msra.mxu0 %v2206_v11  ;;  %v366_v11 = vld [vmem:[#allocation4 + $0x908] sm:$0xff] }
  0xaa   :  { %2209 = vmatprep.subr.bf16.mxu0 %v2208_v13  ;;  %v352_v13 = vld [vmem:[#allocation4 + $0x898] sm:$0xff]  ;;  %v669_v34 = vcombine.high %v2625_v14, %v2628_v15  ;;  %v374_v0 = vld [vmem:[#allocation4 + $0x948] sm:$0xff] }
  0xab   :  { %2239 = vmatpush3.bf16.msra.mxu1 %v2238_v12  ;;  %v351_v12 = vld [vmem:[#allocation4 + $0x890] sm:$0xff] }
  0xac   :  { %2241 = vmatprep.subr.bf16.mxu1 %v2240_v18  ;;  %v383_v18 = vld [vmem:[#allocation4 + $0x990] sm:$0xff] }
  0xad   :  { %2211 = vmatpush3.bf16.msra.mxu0 %v2210_v27  ;;  %v2290_v27 = vpack.c.bf16 %v366_v11, %v365_v8  ;;  %v2292_v17 = vpack.c.bf16 %v384_v19, %v383_v18  ;;  %v2274_v8 = vpack.c.bf16 %v342_v62, %v341_v58  ;;  %v2308_v18 = vpack.c.bf16 %v392_v7, %v391_v6  ;;  %v376_v19 = vld [vmem:[#allocation4 + $0x958] sm:$0xff]  ;;  %v429_v58 = vld [vmem:[#allocation4 + $0xb00] sm:$0xff] }
  0xae   :  { %2213 = vmatprep.subr.bf16.mxu0 %v2212_v29  ;;  %v335_v29 = vld [vmem:[#allocation4 + $0x810] sm:$0xff]  ;;  %v416_v62 = vld [vmem:[#allocation4 + $0xa98] sm:$0xff]  ;;  %v670_v7 = vcombine.low %v2633_v20, %v2636_v22 }
  0xaf   :  { %2243 = vmatpush3.bf16.msra.mxu1 %v2242_v28  ;;  %v2260_v28 = vpack.c.bf16 %v352_v13, %v351_v12  ;;  %v2262_v45 = vpack.c.bf16 %v336_v30, %v335_v29  ;;  %v343_v12 = vld [vmem:[#allocation4 + $0x850] sm:$0xff]  ;;  %v344_v13 = vld [vmem:[#allocation4 + $0x858] sm:$0xff] }
  0xb0   :  { %2245 = vmatprep.subr.bf16.mxu1 %v2244_v33  ;;  %v354_v33 = vld [vmem:[#allocation4 + $0x8a8] sm:$0xff]  ;;  %v2278_v29 = vpack.c.bf16 %v344_v13, %v343_v12  ;;  %v400_v12 = vld [vmem:[#allocation4 + $0xa18] sm:$0xff] }
  0xb1   :  { %2215 = vmatpush3.bf16.msra.mxu0 %v2214_v41  ;;  %v2264_v39 = vpack.c.bf16 %v354_v33, %v353_v32  ;;  %v338_v41 = vld [vmem:[#allocation4 + $0x828] sm:$0xff]  ;;  %v377_v32 = vld [vmem:[#allocation4 + $0x960] sm:$0xff]  ;;  %v432_v13 = vld [vmem:[#allocation4 + $0xb18] sm:$0xff] }
  0xb2   :  { %2217 = vmatprep.subr.bf16.mxu0 %v2216_v23  ;;  %v356_v23 = vld [vmem:[#allocation4 + $0x8b8] sm:$0xff]  ;;  %v2266_v48 = vpack.c.bf16 %v338_v41, %v337_v40  ;;  %v379_v41 = vld [vmem:[#allocation4 + $0x970] sm:$0xff] }
  0xb3   :  { %2247 = vmatpush3.bf16.msra.mxu1 %v2246_v44  ;;  %v355_v44 = vld [vmem:[#allocation4 + $0x8b0] sm:$0xff]  ;;  %v348_v40 = vld [vmem:[#allocation4 + $0x878] sm:$0xff] }
  0xb4   :  { %2249 = vmatprep.subr.bf16.mxu1 %v2248_v47  ;;  %v388_v47 = vld [vmem:[#allocation4 + $0x9b8] sm:$0xff]  ;;  %v2268_v50 = vpack.c.bf16 %v356_v23, %v355_v44  ;;  %v413_v44 = vld [vmem:[#allocation4 + $0xa80] sm:$0xff]  ;;  %v414_v23 = vld [vmem:[#allocation4 + $0xa88] sm:$0xff] }
  0xb5   :  { %2219 = vmatpush3.bf16.msra.mxu0 %v2218_v51  ;;  %v339_v51 = vld [vmem:[#allocation4 + $0x830] sm:$0xff]  ;;  %v2300_v55 = vpack.c.bf16 %v388_v47, %v387_v46  ;;  %v445_v47 = vld [vmem:[#allocation4 + $0xb80] sm:$0xff] }
  0xb6   :  { %2221 = vmatprep.subr.bf16.mxu0 %v2220_v52  ;;  %v357_v52 = vld [vmem:[#allocation4 + $0x8c0] sm:$0xff]  ;;  %v2270_v61 = vpack.c.bf16 %v340_v53, %v339_v51  ;;  %v2426_v51 = vld [vmem:[#allocation2 + $0x2c] ss:$48 sps:$4 sm:$0xff]  }
  0xb7   :  { %2251 = vmatpush3.bf16.msra.mxu1 %v2250_v56  ;;  %v372_v56 = vld [vmem:[#allocation4 + $0x938] sm:$0xff]  ;;  %v2272_v2 = vpack.c.bf16 %v358_v57, %v357_v52  ;;  %v397_v52 = vld [vmem:[#allocation4 + $0xa00] sm:$0xff]  ;;  %v398_v57 = vld [vmem:[#allocation4 + $0xa08] sm:$0xff] }
  0xb8   :  { %2253 = vmatprep.subr.bf16.mxu1 %v2252_v60  ;;  %v390_v60 = vld [vmem:[#allocation4 + $0x9c8] sm:$0xff]  ;;  %v2302_v1 = vpack.c.bf16 %v372_v56, %v371_v54  ;;  %v2320_v56 = vpack.c.bf16 %v414_v23, %v413_v44  ;;  %v2322_v6 = vpack.c.bf16 %v398_v57, %v397_v52  ;;  %v456_v52 = vld [vmem:[#allocation4 + $0xbd8] sm:$0xff] }
  0xb9   :  { %2223 = vmatpush3.bf16.msra.mxu0 %v2222_v3  ;;  %v359_v3 = vld [vmem:[#allocation4 + $0x8d0] sm:$0xff]  ;;  %v2427_v53 = vld [vmem:[#allocation2 + $0x8c] ss:$48 sps:$4 sm:$0xff]  }
  0xba   :  { %2257 = vmatprep.subr.bf16.mxu0 %v2256_v5  ;;  %v360_v5 = vld [vmem:[#allocation4 + $0x8d8] sm:$0xff]  ;;  %v454_v44 = vld [vmem:[#allocation4 + $0xbc8] sm:$0xff] }
  0xbb   :  { %2255 = vmatpush3.bf16.msra.mxu1 %v2254_v4  ;;  %v2304_v4 = vpack.c.bf16 %v390_v60, %v389_v59  ;;  %v2276_v11 = vpack.c.bf16 %v360_v5, %v359_v3  ;;  %v430_v60 = vld [vmem:[#allocation4 + $0xb08] sm:$0xff]  ;;  %v448_v3 = vld [vmem:[#allocation4 + $0xb98] sm:$0xff]  ;;  %v2656_v5 = vrot.slane %v2427_v53, %v2562_v21 }
  0xbc   :  { %2289 = vmatprep.subr.bf16.mxu1 %v2288_v10  ;;  %1217 = vmatmul.mubr.f32.vlgmr.msra.gmra.mrb[6].mxu0 %v632_v16  ;;  %v2306_v10 = vpack.c.bf16 %v374_v0, %v373_v63  ;;  %v375_v16 = vld [vmem:[#allocation4 + $0x950] sm:$0xff]  ;;  %v438_v53 = vld [vmem:[#allocation4 + $0xb48] sm:$0xff] }
  0xbd   :  { %2259 = vmatpush3.bf16.msra.mxu0 %v2258_v25  ;;  %1356 = vmatprep.mubr.f32.mxu0 %v669_v34  ;;  %v361_v25 = vld [vmem:[#allocation4 + $0x8e0] sm:$0xff]  ;;  %v2310_v30 = vpack.c.bf16 %v376_v19, %v375_v16  ;;  %v378_v34 = vld [vmem:[#allocation4 + $0x968] sm:$0xff] }
  0xbe   :  { %1287 = vmatmul.mubr.f32.vlgmr.msra.gmra.mrb[6].mxu1 %v634_v26  ;;  %2261 = vmatprep.subr.bf16.mxu0 %v2260_v28  ;;  %v362_v26 = vld [vmem:[#allocation4 + $0x8e8] sm:$0xff]  ;;  %v2314_v9 = vpack.c.bf16 %v378_v34, %v377_v32  ;;  %v417_v16 = vld [vmem:[#allocation4 + $0xaa0] sm:$0xff]  ;;  %v420_v32 = vld [vmem:[#allocation4 + $0xab8] sm:$0xff] }
  0xbf   :  { %2291 = vmatpush3.bf16.msra.mxu1 %v2290_v27  ;;  %1426 = vmatprep.mubr.f32.mxu1 %v671_v24  ;;  %v393_v27 = vld [vmem:[#allocation4 + $0x9e0] sm:$0xff]  ;;  %v394_v28 = vld [vmem:[#allocation4 + $0x9e8] sm:$0xff]  ;;  %v2280_v35 = vpack.c.bf16 %v362_v26, %v361_v25  ;;  %v395_v24 = vld [vmem:[#allocation4 + $0x9f0] sm:$0xff] }
  0xc0   :  { %2293 = vmatprep.subr.bf16.mxu1 %v2292_v17  ;;  %v345_v17 = vld [vmem:[#allocation4 + $0x860] sm:$0xff]  ;;  %v2312_v33 = vpack.c.bf16 %v394_v28, %v393_v27  ;;  %v450_v25 = vld [vmem:[#allocation4 + $0xba8] sm:$0xff]  ;;  %v452_v34 = vld [vmem:[#allocation4 + $0xbb8] sm:$0xff] }
  0xc1   :  { %2263 = vmatpush3.bf16.msra.mxu0 %v2262_v45  ;;  %v396_v45 = vld [vmem:[#allocation4 + $0x9f8] sm:$0xff]  ;;  %v449_v19 = vld [vmem:[#allocation4 + $0xba0] sm:$0xff] }
  0xc2   :  { %2265 = vmatprep.subr.bf16.mxu0 %v2264_v39  ;;  %v347_v39 = vld [vmem:[#allocation4 + $0x870] sm:$0xff]  ;;  %v2316_v46 = vpack.c.bf16 %v396_v45, %v395_v24  ;;  %v401_v28 = vld [vmem:[#allocation4 + $0xa20] sm:$0xff] }
  0xc3   :  { %2295 = vmatpush3.bf16.msra.mxu1 %v2294_v38  ;;  %v2282_v38 = vpack.c.bf16 %v346_v31, %v345_v17  ;;  %v2286_v54 = vpack.c.bf16 %v348_v40, %v347_v39  ;;  %v434_v17 = vld [vmem:[#allocation4 + $0xb28] sm:$0xff]  ;;  %v419_v31 = vld [vmem:[#allocation4 + $0xab0] sm:$0xff] }
  0xc4   :  { %2297 = vmatprep.subr.bf16.mxu1 %v2296_v42  ;;  %v2284_v42 = vpack.c.bf16 %v364_v37, %v363_v36  ;;  %v2332_v24 = vpack.c.bf16 %v420_v32, %v419_v31  ;;  %v403_v45 = vld [vmem:[#allocation4 + $0xa30] sm:$0xff] }
  0xc5   :  { %2267 = vmatpush3.bf16.msra.mxu0 %v2266_v48  ;;  %v2422_v48 = vld [vmem:[#allocation2 + $0x28] ss:$48 sps:$4 sm:$0xff]   ;;  %v435_v39 = vld [vmem:[#allocation4 + $0xb30] sm:$0xff] }
  0xc6   :  { %2269 = vmatprep.subr.bf16.mxu0 %v2268_v50  ;;  %v446_v50 = vld [vmem:[#allocation4 + $0xb88] sm:$0xff]  ;;  %v2645_v63 = vrot.slane %v2422_v48, %v2562_v21  ;;  %v405_v48 = vld [vmem:[#allocation4 + $0xa40] sm:$0xff] }
  0xc7   :  { %2299 = vmatpush3.bf16.msra.mxu1 %v2298_v49  ;;  %v2424_v49 = vld [vmem:[#allocation2 + $0x88] ss:$48 sps:$4 sm:$0xff]   ;;  %v2352_v59 = vpack.c.bf16 %v446_v50, %v445_v47  ;;  %v437_v50 = vld [vmem:[#allocation4 + $0xb40] sm:$0xff] }
  0xc8   :  { %2301 = vmatprep.subr.bf16.mxu1 %v2300_v55  ;;  %v2318_v55 = vpack.c.bf16 %v380_v43, %v379_v41  ;;  %v2648_v0 = vrot.slane %v2424_v49, %v2562_v21  ;;  %v436_v41 = vld [vmem:[#allocation4 + $0xb38] sm:$0xff]  ;;  %v453_v43 = vld [vmem:[#allocation4 + $0xbc0] sm:$0xff]  ;;  %v406_v49 = vld [vmem:[#allocation4 + $0xa48] sm:$0xff] }
  0xc9   :  { %2271 = vmatpush3.bf16.msra.mxu0 %v2270_v61  ;;  %v415_v61 = vld [vmem:[#allocation4 + $0xa90] sm:$0xff]  ;;  %v2338_v57 = vpack.c.bf16 %v406_v49, %v405_v48 }
  0xca   :  { %2273 = vmatprep.subr.bf16.mxu0 %v2272_v2  ;;  %v447_v2 = vld [vmem:[#allocation4 + $0xb90] sm:$0xff] }
  0xcb   :  { %2303 = vmatpush3.bf16.msra.mxu1 %v2302_v1  ;;  %v668_v1 = vcombine.low %v2625_v14, %v2628_v15  ;;  %v431_v14 = vld [vmem:[#allocation4 + $0xb10] sm:$0xff]  ;;  %v2356_v15 = vpack.c.bf16 %v448_v3, %v447_v2  ;;  %v440_v2 = vld [vmem:[#allocation4 + $0xb58] sm:$0xff]  ;;  %v425_v3 = vld [vmem:[#allocation4 + $0xae0] sm:$0xff] }
  0xcc   :  { %2305 = vmatprep.subr.bf16.mxu1 %v2304_v4  ;;  %v2653_v4 = vrot.slane %v2426_v51, %v2562_v21  ;;  %v705_v21 = vcombine.high %v2645_v63, %v2648_v0  ;;  %v2358_v26 = vpack.c.bf16 %v432_v13, %v431_v14  ;;  %v2368_v51 = vpack.c.bf16 %v454_v44, %v453_v43  ;;  %v409_v14 = vld [vmem:[#allocation4 + $0xa60] sm:$0xff] }
  0xcd   :  { %2275 = vmatpush3.bf16.msra.mxu0 %v2274_v8  ;;  %v2354_v8 = vpack.c.bf16 %v430_v60, %v429_v58  ;;  %v2370_v58 = vpack.c.bf16 %v438_v53, %v437_v50  ;;  %v407_v60 = vld [vmem:[#allocation4 + $0xa50] sm:$0xff]  ;;  %v441_v13 = vld [vmem:[#allocation4 + $0xb60] sm:$0xff] }
  0xce   :  { %2277 = vmatprep.subr.bf16.mxu0 %v2276_v11  ;;  %v399_v11 = vld [vmem:[#allocation4 + $0xa10] sm:$0xff]  ;;  %v707_v20 = vcombine.high %v2653_v4, %v2656_v5 }
  0xcf   :  { %2307 = vmatpush3.bf16.msra.mxu1 %v2306_v10  ;;  %v2324_v10 = vpack.c.bf16 %v416_v62, %v415_v61  ;;  %v2326_v22 = vpack.c.bf16 %v400_v12, %v399_v11  ;;  %v408_v61 = vld [vmem:[#allocation4 + $0xa58] sm:$0xff]  ;;  %v439_v62 = vld [vmem:[#allocation4 + $0xb50] sm:$0xff] }
  0xd0   :  { %2309 = vmatprep.subr.bf16.mxu1 %v2308_v18  ;;  %v418_v18 = vld [vmem:[#allocation4 + $0xaa8] sm:$0xff]  ;;  %v2374_v11 = vpack.c.bf16 %v440_v2, %v439_v62 }
  0xd1   :  { %2279 = vmatpush3.bf16.msra.mxu0 %v2278_v29  ;;  %v2328_v27 = vpack.c.bf16 %v418_v18, %v417_v16  ;;  %v402_v29 = vld [vmem:[#allocation4 + $0xa28] sm:$0xff] }
  0xd2   :  { %2281 = vmatprep.subr.bf16.mxu0 %v2280_v35  ;;  %v2360_v35 = vpack.c.bf16 %v450_v25, %v449_v19  ;;  %v2330_v36 = vpack.c.bf16 %v402_v29, %v401_v28  ;;  %v442_v18 = vld [vmem:[#allocation4 + $0xb68] sm:$0xff]  ;;  %v428_v19 = vld [vmem:[#allocation4 + $0xaf8] sm:$0xff]  ;;  %v459_v25 = vld [vmem:[#allocation4 + $0xbf0] sm:$0xff] }
  0xd3   :  { %2311 = vmatpush3.bf16.msra.mxu1 %v2310_v30  ;;  %v433_v30 = vld [vmem:[#allocation4 + $0xb20] sm:$0xff]  ;;  %v411_v28 = vld [vmem:[#allocation4 + $0xa70] sm:$0xff]  ;;  %v412_v29 = vld [vmem:[#allocation4 + $0xa78] sm:$0xff] }
  0xd4   :  { %2313 = vmatprep.subr.bf16.mxu1 %v2312_v33  ;;  %v451_v33 = vld [vmem:[#allocation4 + $0xbb0] sm:$0xff]  ;;  %v2362_v37 = vpack.c.bf16 %v434_v17, %v433_v30  ;;  %v444_v17 = vld [vmem:[#allocation4 + $0xb78] sm:$0xff]  ;;  %v2350_v31 = vpack.c.bf16 %v412_v29, %v411_v28 }
  0xd5   :  { %2283 = vmatpush3.bf16.msra.mxu0 %v2282_v38  ;;  %v404_v38 = vld [vmem:[#allocation4 + $0xa38] sm:$0xff]  ;;  %v2364_v40 = vpack.c.bf16 %v452_v34, %v451_v33  ;;  %v704_v33 = vcombine.low %v2645_v63, %v2648_v0  ;;  %v706_v34 = vcombine.low %v2653_v4, %v2656_v5 }
  0xd6   :  { %2285 = vmatprep.subr.bf16.mxu0 %v2284_v42  ;;  %v422_v42 = vld [vmem:[#allocation4 + $0xac8] sm:$0xff]  ;;  %v2334_v23 = vpack.c.bf16 %v404_v38, %v403_v45 }
  0xd7   :  { %2315 = vmatpush3.bf16.msra.mxu1 %v2314_v9  ;;  %v421_v9 = vld [vmem:[#allocation4 + $0xac0] sm:$0xff] }
  0xd8   :  { %2317 = vmatprep.subr.bf16.mxu1 %v2316_v46  ;;  %v2366_v46 = vpack.c.bf16 %v436_v41, %v435_v39  ;;  %v2336_v47 = vpack.c.bf16 %v422_v42, %v421_v9 }
  0xd9   :  { %2287 = vmatpush3.bf16.msra.mxu0 %v2286_v54  ;;  %v423_v54 = vld [vmem:[#allocation4 + $0xad0] sm:$0xff] }
  0xda   :  { %2321 = vmatprep.subr.bf16.mxu0 %v2320_v56  ;;  %v455_v56 = vld [vmem:[#allocation4 + $0xbd0] sm:$0xff] }
  0xdb   :  { %2319 = vmatpush3.bf16.msra.mxu1 %v2318_v55  ;;  %v424_v55 = vld [vmem:[#allocation4 + $0xad8] sm:$0xff] }
  0xdc   :  { %2353 = vmatprep.subr.bf16.mxu1 %v2352_v59  ;;  %1357 = vmatmul.mubr.f32.vlgmr.msra.gmra.mrb[8].mxu0 %v668_v1  ;;  %v2340_v59 = vpack.c.bf16 %v424_v55, %v423_v54  ;;  %v2372_v1 = vpack.c.bf16 %v456_v52, %v455_v56 }
  0xdd   :  { %2323 = vmatpush3.bf16.msra.mxu0 %v2322_v6  ;;  %1496 = vmatprep.mubr.f32.mxu0 %v705_v21  ;;  %v426_v6 = vld [vmem:[#allocation4 + $0xae8] sm:$0xff]  ;;  %v427_v21 = vld [vmem:[#allocation4 + $0xaf0] sm:$0xff] }
  0xde   :  { %1427 = vmatmul.mubr.f32.vlgmr.msra.gmra.mrb[8].mxu1 %v670_v7  ;;  %2325 = vmatprep.subr.bf16.mxu0 %v2324_v10  ;;  %v457_v7 = vld [vmem:[#allocation4 + $0xbe0] sm:$0xff]  ;;  %v2342_v10 = vpack.c.bf16 %v408_v61, %v407_v60  ;;  %v2344_v12 = vpack.c.bf16 %v426_v6, %v425_v3 }
  0xdf   :  { %2355 = vmatpush3.bf16.msra.mxu1 %v2354_v8  ;;  %1566 = vmatprep.mubr.f32.mxu1 %v707_v20  ;;  %v458_v8 = vld [vmem:[#allocation4 + $0xbe8] sm:$0xff]  ;;  %v460_v20 = vld [vmem:[#allocation4 + $0xbf8] sm:$0xff] }
  0xe0   :  { %2357 = vmatprep.subr.bf16.mxu1 %v2356_v15  ;;  %v410_v15 = vld [vmem:[#allocation4 + $0xa68] sm:$0xff]  ;;  %v2376_v16 = vpack.c.bf16 %v458_v8, %v457_v7  ;;  %v2380_v30 = vpack.c.bf16 %v460_v20, %v459_v25 }
  0xe1   :  { %2327 = vmatpush3.bf16.msra.mxu0 %v2326_v22  ;;  %v2346_v22 = vpack.c.bf16 %v410_v15, %v409_v14 }
  0xe2   :  { %2329 = vmatprep.subr.bf16.mxu0 %v2328_v27  ;;  %v2348_v27 = vpack.c.bf16 %v428_v19, %v427_v21 }
  0xe3   :  { %2359 = vmatpush3.bf16.msra.mxu1 %v2358_v26  ;;  %v2378_v26 = vpack.c.bf16 %v442_v18, %v441_v13 }
  0xe4   :  { %2361 = vmatprep.subr.bf16.mxu1 %v2360_v35  ;;  %v443_v35 = vld [vmem:[#allocation4 + $0xb70] sm:$0xff] }
  0xe5   :  { %2331 = vmatpush3.bf16.msra.mxu0 %v2330_v36  ;;  %v2382_v32 = vpack.c.bf16 %v444_v17, %v443_v35 }
  0xe6   :  { %2333 = vmatprep.subr.bf16.mxu0 %v2332_v24 }
  0xe7   :  { %2363 = vmatpush3.bf16.msra.mxu1 %v2362_v37  ;;  %v1579_v37 = vld [vmem:[#allocation6] ss:$0 sm:$0xff] }
  0xe8   :  { %2365 = vmatprep.subr.bf16.mxu1 %v2364_v40 }
  0xe9   :  { %2335 = vmatpush3.bf16.msra.mxu0 %v2334_v23 }
  0xea   :  { %2337 = vmatprep.subr.bf16.mxu0 %v2336_v47 }
  0xeb   :  { %2367 = vmatpush3.bf16.msra.mxu1 %v2366_v46 }
  0xec   :  { %2369 = vmatprep.subr.bf16.mxu1 %v2368_v51 }
  0xed   :  { %2339 = vmatpush3.bf16.msra.mxu0 %v2338_v57 }
  0xee   :  { %2341 = vmatprep.subr.bf16.mxu0 %v2340_v59 }
  0xef   :  { %2371 = vmatpush3.bf16.msra.mxu1 %v2370_v58 }
  0xf0   :  { %2373 = vmatprep.subr.bf16.mxu1 %v2372_v1 }
  0xf1   :  { %2343 = vmatpush3.bf16.msra.mxu0 %v2342_v10 }
  0xf2   :  { %2345 = vmatprep.subr.bf16.mxu0 %v2344_v12 }
  0xf3   :  { %2375 = vmatpush3.bf16.msra.mxu1 %v2374_v11 }
  0xf4   :  { %2377 = vmatprep.subr.bf16.mxu1 %v2376_v16 }
  0xf5   :  { %2347 = vmatpush3.bf16.msra.mxu0 %v2346_v22 }
  0xf6   :  { %2349 = vmatprep.subr.bf16.mxu0 %v2348_v27 }
  0xf7   :  { %2379 = vmatpush3.bf16.msra.mxu1 %v2378_v26 }
  0xf8   :  { %2381 = vmatprep.subr.bf16.mxu1 %v2380_v30 }
  0xf9   :  { %2351 = vmatpush3.bf16.msra.mxu0 %v2350_v31 }
  0xfb   :  { %2383 = vmatpush3.bf16.msra.mxu1 %v2382_v32 }
  0xfc   :  { %1497 = vmatmul.mubr.f32.vlgmr.msra.gmra.mrb[10].mxu0 %v704_v33 }
  0xfe   :  { %1567 = vmatmul.mubr.f32.vlgmr.msra.gmra.mrb[10].mxu1 %v706_v34 }
 0x12f   :  { %v1612_v36 = vpop.f32.mrb[0].mxu0 }
 0x130   :  { %v1613_v24 = vpop.f32.mrb[1].mxu0 }
 0x131   :  { %v1647_v45 = vpop.f32.mrb[0].mxu1  ;;  %v1614_v38 = vadd.f32 %v1613_v24, %v1612_v36 }
 0x132   :  { %v1648_v39 = vpop.f32.mrb[1].mxu1 }
 0x133   :  { %v1649_v40 = vadd.f32 %v1648_v39, %v1647_v45  ;;  %v799_v41 = vadd.f32 %v1614_v38, %v1579_v37 }
 0x135   :  { %v869_v9 = vadd.f32 %v1649_v40, %v799_v41 }
 0x14f   :  { %v1682_v42 = vpop.f32.mrb[2].mxu0 }
 0x150   :  { %v1683_v43 = vpop.f32.mrb[3].mxu0 }
 0x151   :  { %v1717_v44 = vpop.f32.mrb[2].mxu1  ;;  %v1684_v63 = vadd.f32 %v1683_v43, %v1682_v42 }
 0x152   :  { %v1718_v0 = vpop.f32.mrb[3].mxu1 }
 0x153   :  { %v1719_v23 = vadd.f32 %v1718_v0, %v1717_v44  ;;  %v939_v46 = vadd.f32 %v1684_v63, %v869_v9 }
 0x155   :  { %v1009_v4 = vadd.f32 %v1719_v23, %v939_v46 }
 0x16f   :  { %v1752_v5 = vpop.f32.mrb[4].mxu0 }
 0x170   :  { %v1753_v47 = vpop.f32.mrb[5].mxu0 }
 0x171   :  { %v1787_v48 = vpop.f32.mrb[4].mxu1  ;;  %v1754_v49 = vadd.f32 %v1753_v47, %v1752_v5 }
 0x172   :  { %v1788_v50 = vpop.f32.mrb[5].mxu1 }
 0x173   :  { %v1789_v51 = vadd.f32 %v1788_v50, %v1787_v48  ;;  %v1079_v53 = vadd.f32 %v1754_v49, %v1009_v4 }
 0x175   :  { %v1149_v54 = vadd.f32 %v1789_v51, %v1079_v53 }
 0x18f   :  { %v1822_v55 = vpop.f32.mrb[6].mxu0 }
 0x190   :  { %v1823_v56 = vpop.f32.mrb[7].mxu0 }
 0x191   :  { %v1857_v52 = vpop.f32.mrb[6].mxu1  ;;  %v1824_v57 = vadd.f32 %v1823_v56, %v1822_v55 }
 0x192   :  { %v1858_v58 = vpop.f32.mrb[7].mxu1 }
 0x193   :  { %v1859_v59 = vadd.f32 %v1858_v58, %v1857_v52  ;;  %v1219_v60 = vadd.f32 %v1824_v57, %v1149_v54 }
 0x195   :  { %v1289_v61 = vadd.f32 %v1859_v59, %v1219_v60 }
 0x1af   :  { %v1892_v62 = vpop.f32.mrb[8].mxu0 }
 0x1b0   :  { %v1893_v1 = vpop.f32.mrb[9].mxu0 }
 0x1b1   :  { %v1927_v2 = vpop.f32.mrb[8].mxu1  ;;  %v1894_v3 = vadd.f32 %v1893_v1, %v1892_v62 }
 0x1b2   :  { %v1928_v6 = vpop.f32.mrb[9].mxu1 }
 0x1b3   :  { %v1929_v7 = vadd.f32 %v1928_v6, %v1927_v2  ;;  %v1359_v8 = vadd.f32 %v1894_v3, %v1289_v61 }
 0x1b5   :  { %v1429_v10 = vadd.f32 %v1929_v7, %v1359_v8 }
 0x1cf   :  { %v1962_v11 = vpop.f32.mrb[10].mxu0 }
 0x1d0   :  { %v1963_v12 = vpop.f32.mrb[11].mxu0 }
 0x1d1   :  { %v1997_v14 = vpop.f32.mrb[10].mxu1  ;;  %v1964_v15 = vadd.f32 %v1963_v12, %v1962_v11 }
 0x1d2   :  { %v1998_v13 = vpop.f32.mrb[11].mxu1 }
 0x1d3   :  { %v1999_v16 = vadd.f32 %v1998_v13, %v1997_v14  ;;  %v1499_v18 = vadd.f32 %v1964_v15, %v1429_v10 }
 0x1d5   :  { %v1569_v21 = vadd.f32 %v1999_v16, %v1499_v18 }
 0x1d7   :  { %1572 = vst [vmem:[%s2674_s3] sm:$0xff] %v1569_v21 }
 0x1d8   :  { %1577 = vsyncpa [#allocation3], 1 }
 0x1d9   :  { %1578 = vsyncpa [#allocation5], 1 }

</bundles_post_ra>
